<compile_context>
chip_gen: v7x
topology: tpu7x:2x2x1
jax: 0.10.0
libtpu: 0.0.40
codegen_flags: <defaults>
</compile_context>

<pallas_src>
import functools

import jax
import jax.numpy as jnp
import numpy as np
from jax import lax
from jax.experimental import pallas as pl
from jax.experimental.pallas import tpu as pltpu

CARDINALITY = 32   # BottleneckX.cardinality
EXPANSION = 2      # BottleneckX.expansion (unused in forward)
BN_EPS = 1e-5


def _bottleneckx_kernel(*refs, height, width, dilation, cpg, col_pad,
                        has_residual):
    """One batch element per grid step."""
    if has_residual:
        (x_ref, res_ref, w1_ref, b1_ref, w2s_ref, b2_ref, w3_ref, b3_ref,
         out_ref, pad_ref) = refs
    else:
        (x_ref, w1_ref, b1_ref, w2s_ref, b2_ref, w3_ref, b3_ref,
         out_ref, pad_ref) = refs
        res_ref = None

    H, W, d = height, width, dilation
    HW = H * W
    Cb = w1_ref.shape[1]
    nshift = 2 * cpg - 1
    co = cpg - 1                      # channel offset of t1 inside pad_ref

    x = x_ref[0]                                                  # (HW, Cin) bf16

    # ---- conv1 (1x1) + bn1 (scale folded into w1) + relu ------------------
    t1 = jnp.dot(x, w1_ref[...], preferred_element_type=jnp.float32)
    t1 = jnp.maximum(t1 + b1_ref[...], 0.0)                       # (HW, Cb) f32

    # Stage t1 in a padded VMEM scratch.  Halo regions are never written (and
    # never zeroed) -- they are masked out on read -- so the store below is the
    # only write and its row/column offsets are sublane-aligned.
    pad_ref[d:d + H, col_pad:col_pad + W, co:co + Cb] = t1.reshape(H, W, Cb)

    # ---- conv2 (3x3, groups=32, stride=1, dilation=d) + bn2 + relu --------
    # Compact grouped form: for each of the 9 taps and each intra-group channel
    # shift s, contribution = shifted window * per-output-channel scale (bn2
    # scale folded in).  cpg == 1 -> pure depthwise VPU multiply-accumulate.
    hh = lax.broadcasted_iota(jnp.int32, (H, W, 1), 0)
    ww = lax.broadcasted_iota(jnp.int32, (H, W, 1), 1)
    cc = (lax.broadcasted_iota(jnp.int32, (1, 1, Cb), 2) % cpg) if cpg > 1 else None

    acc = jnp.zeros((H, W, Cb), jnp.float32)
    for kh in range(3):
        for kw in range(3):
            dh = (kh - 1) * d
            dw = (kw - 1) * d
            conds = []
            if dh < 0:
                conds.append(hh >= -dh)
            elif dh > 0:
                conds.append(hh < H - dh)
            if dw < 0:
                conds.append(ww >= -dw)
            elif dw > 0:
                conds.append(ww < W - dw)
            for si in range(nshift):
                s = si - (cpg - 1)
                win = pad_ref[kh * d:kh * d + H,
                              col_pad + dw:col_pad + dw + W,
                              co - s:co - s + Cb]                 # (H, W, Cb)
                m = None
                for c in conds:
                    m = c if m is None else jnp.logical_and(m, c)
                if cpg > 1:
                    cm = jnp.logical_and(cc - s >= 0, cc - s < cpg)
                    m = cm if m is None else jnp.logical_and(m, cm)
                if m is not None:
                    win = jnp.where(m, win, 0.0)
                row = (kh * 3 + kw) * nshift + si
                scale = w2s_ref[row:row + 1, :].reshape(1, 1, Cb)
                acc = acc + win * scale
    t2 = jnp.maximum(acc + b2_ref[...].reshape(1, 1, Cb), 0.0)    # (H, W, Cb)

    # ---- conv3 (1x1) + bn3 (scale folded into w3) + residual + relu -------
    t3 = jnp.dot(t2.reshape(HW, Cb).astype(w3_ref.dtype), w3_ref[...],
                 preferred_element_type=jnp.float32)
    t3 = t3 + b3_ref[...]
    if has_residual:
        t3 = t3 + res_ref[0].astype(jnp.float32)
    else:
        t3 = t3 + x.astype(jnp.float32)   # identity residual: reuse loaded x
    out_ref[0] = jnp.maximum(t3, 0.0).astype(out_ref.dtype)


def _fold_bn(gamma, beta, mean, var):
    scale = (gamma / jnp.sqrt(var + BN_EPS)).astype(jnp.float32)
    bias = (beta - mean * scale).astype(jnp.float32)
    return scale, bias


def _group_scale_table(w2_pt, s2, cpg):
    """PyTorch grouped weight (Cb, cpg, 3, 3) + bn2 scale -> (9*(2cpg-1), Cb).

    Row (kh*3+kw)*nshift + si holds, for output channel o, the weight
    W[o, (o % cpg) - s, kh, kw] (0 if that intra-group index is invalid),
    pre-multiplied by the folded bn2 scale, where s = si - (cpg - 1).
    """
    w2_pt = jnp.asarray(w2_pt, jnp.float32)
    Cb = w2_pt.shape[0]
    nshift = 2 * cpg - 1
    o = jnp.arange(Cb)
    dd = o % cpg
    rows = []
    for kh in range(3):
        for kw in range(3):
            for si in range(nshift):
                s = si - (cpg - 1)
                c = dd - s
                valid = (c >= 0) & (c < cpg)
                cidx = jnp.clip(c, 0, cpg - 1)
                vals = w2_pt[o, cidx, kh, kw]
                rows.append(jnp.where(valid, vals, 0.0) * s2)
    return jnp.stack(rows, axis=0)


def bottleneckx_forward(x, params, *, stride=1, dilation=1, residual=None):
    """x: (N, H, W, Cin) NHWC float32.  Eval-mode BatchNorm (folded)."""
    # TODO(synk): only stride=1 is implemented (the module's residual add needs
    # matching spatial dims, which only holds for stride=1 without downsample).
    assert stride == 1

    N, H, W, Cin = x.shape
    out_dtype = x.dtype
    w1 = jnp.asarray(params["w1"], jnp.float32)     # (Cin, Cb)
    w3 = jnp.asarray(params["w3"], jnp.float32)     # (Cb, Cout)
    Cb = w1.shape[1]
    Cout = w3.shape[1]
    assert Cb % CARDINALITY == 0
    cpg = Cb // CARDINALITY

    s1, b1 = _fold_bn(*params["bn1"])
    s2, b2 = _fold_bn(*params["bn2"])
    s3, b3 = _fold_bn(*params["bn3"])

    # Fold BN scales into the 1x1 weights / grouped scale table; bf16 MXU feeds.
    w1b = (w1 * s1[None, :]).astype(jnp.bfloat16)
    w3b = (w3 * s3[None, :]).astype(jnp.bfloat16)
    w2s = _group_scale_table(params["w2"], s2, cpg)  # (9*(2cpg-1), Cb) f32
    b1 = b1.reshape(1, Cb)
    b2 = b2.reshape(1, Cb)
    b3 = b3.reshape(1, Cout)

    xb = x.astype(jnp.bfloat16).reshape(N, H * W, Cin)
    has_residual = residual is not None

    inputs = [xb]
    in_specs = [pl.BlockSpec((1, H * W, Cin), lambda n: (n, 0, 0))]
    if has_residual:
        rb = jnp.asarray(residual).astype(jnp.bfloat16).reshape(N, H * W, Cout)
        inputs.append(rb)
        in_specs.append(pl.BlockSpec((1, H * W, Cout), lambda n: (n, 0, 0)))
    else:
        assert Cin == Cout, "identity residual requires inplanes == planes"

    def _full(a):
        return pl.BlockSpec(a.shape, lambda n: (0,) * a.ndim)

    weights = [w1b, b1, w2s, b2, w3b, b3]
    inputs += weights
    in_specs += [_full(a) for a in weights]

    col_pad = ((dilation + 7) // 8) * 8   # sublane-aligned column halo
    kernel = functools.partial(
        _bottleneckx_kernel, height=H, width=W, dilation=dilation, cpg=cpg,
        col_pad=col_pad, has_residual=has_residual)

    out = pl.pallas_call(
        kernel,
        out_shape=jax.ShapeDtypeStruct((N, H * W, Cout), out_dtype),
        grid_spec=pltpu.PrefetchScalarGridSpec(
            num_scalar_prefetch=0,
            grid=(N,),
            in_specs=in_specs,
            out_specs=pl.BlockSpec((1, H * W, Cout), lambda n: (n, 0, 0)),
            scratch_shapes=[
                pltpu.VMEM((H + 2 * dilation, W + 2 * col_pad,
                            Cb + 2 * (cpg - 1)), jnp.float32),
            ],
        ),
        compiler_params=pltpu.CompilerParams(
            dimension_semantics=("parallel",),
            vmem_limit_bytes=64 * 1024 * 1024),
    )(*inputs)
    return out.reshape(N, H, W, Cout)


# ----------------------------- pure-JAX reference -----------------------------
def _reference_forward(x, params, *, stride=1, dilation=1, residual=None):
    if residual is None:
        residual = x

    def bn(y, p):
        gamma, beta, mean, var = p
        return (y - mean) / jnp.sqrt(var + BN_EPS) * gamma + beta

    dn = ('NHWC', 'HWIO', 'NHWC')
    hi = lax.Precision.HIGHEST
    y = lax.conv_general_dilated(x, params["w1"][None, None], (1, 1),
                                 [(0, 0), (0, 0)], dimension_numbers=dn,
                                 precision=hi)
    y = jax.nn.relu(bn(y, params["bn1"]))
    w2 = jnp.transpose(params["w2"], (2, 3, 1, 0))      # (3,3,Cin/groups,Cout)
    y = lax.conv_general_dilated(y, w2, (stride, stride),
                                 [(dilation, dilation), (dilation, dilation)],
                                 rhs_dilation=(dilation, dilation),
                                 dimension_numbers=dn,
                                 feature_group_count=CARDINALITY,
                                 precision=hi)
    y = jax.nn.relu(bn(y, params["bn2"]))
    y = lax.conv_general_dilated(y, params["w3"][None, None], (1, 1),
                                 [(0, 0), (0, 0)], dimension_numbers=dn,
                                 precision=hi)
    y = bn(y, params["bn3"]) + residual
    return jax.nn.relu(y)


def _make_params(key, inplanes, planes):
    bottle_planes = planes * CARDINALITY // 32
    ks = jax.random.split(key, 6)

    def bn_params(k, c):
        k1, k2, k3, k4 = jax.random.split(k, 4)
        gamma = 1.0 + 0.1 * jax.random.normal(k1, (c,), jnp.float32)
        beta = 0.1 * jax.random.normal(k2, (c,), jnp.float32)
        mean = 0.1 * jax.random.normal(k3, (c,), jnp.float32)
        var = jax.random.uniform(k4, (c,), jnp.float32, 0.5, 1.5)
        return (gamma, beta, mean, var)

    return {
        # conv1: PyTorch (Cb, Cin, 1, 1) -> stored as (Cin, Cb)
        "w1": 0.1 * jax.random.normal(ks[0], (inplanes, bottle_planes), jnp.float32),
        "bn1": bn_params(ks[1], bottle_planes),
        # conv2: PyTorch grouped layout (Cb, Cb // groups, 3, 3)
        "w2": 0.1 * jax.random.normal(
            ks[2], (bottle_planes, bottle_planes // CARDINALITY, 3, 3), jnp.float32),
        "bn2": bn_params(ks[3], bottle_planes),
        # conv3: PyTorch (planes, Cb, 1, 1) -> stored as (Cb, planes)
        "w3": 0.1 * jax.random.normal(ks[4], (bottle_planes, planes), jnp.float32),
        "bn3": bn_params(ks[5], planes),
    }


if __name__ == "__main__":
    key = jax.random.PRNGKey(0)
    kx, kp, kx2, kp2, kr = jax.random.split(key, 5)

    # Config A: cpg = 1 (depthwise group conv), identity residual, dilation 1.
    N, H, W = 2, 16, 16
    inplanes = planes = 32
    x = jax.random.normal(kx, (N, H, W, inplanes), jnp.float32)
    params = _make_params(kp, inplanes, planes)
    out = jax.block_until_ready(
        bottleneckx_forward(x, params, stride=1, dilation=1))
    ref = jax.block_until_ready(
        _reference_forward(x, params, stride=1, dilation=1))
    np.testing.assert_allclose(np.asarray(out), np.asarray(ref),
                               rtol=3e-2, atol=3e-2)

    # Config B: cpg = 2 (64 channels / 32 groups), dilation 2, explicit residual.
    N2, H2, W2 = 1, 8, 8
    inp2 = pl2 = 64
    x2 = jax.random.normal(kx2, (N2, H2, W2, inp2), jnp.float32)
    res2 = jax.random.normal(kr, (N2, H2, W2, pl2), jnp.float32)
    params2 = _make_params(kp2, inp2, pl2)
    out2 = jax.block_until_ready(
        bottleneckx_forward(x2, params2, stride=1, dilation=2, residual=res2))
    ref2 = jax.block_until_ready(
        _reference_forward(x2, params2, stride=1, dilation=2, residual=res2))
    np.testing.assert_allclose(np.asarray(out2), np.asarray(ref2),
                               rtol=3e-2, atol=3e-2)

    print("KERNEL_OK")
</pallas_src>

<mosaic_0001>
module attributes {stable_mosaic.version = 11 : i64} {
  func.func @_bottleneckx_kernel(%arg0: i32, %arg1: memref<1x256x32xbf16, #tpu.memory_space<vmem>>, %arg2: memref<32x32xbf16, #tpu.memory_space<vmem>>, %arg3: memref<1x32xf32, #tpu.memory_space<vmem>>, %arg4: memref<9x32xf32, #tpu.memory_space<vmem>>, %arg5: memref<1x32xf32, #tpu.memory_space<vmem>>, %arg6: memref<32x32xbf16, #tpu.memory_space<vmem>>, %arg7: memref<1x32xf32, #tpu.memory_space<vmem>>, %arg8: memref<1x256x32xf32, #tpu.memory_space<vmem>>, %arg9: memref<18x32x32xf32, #tpu.memory_space<vmem>>) attributes {dimension_semantics = [#tpu.dimension_semantics<parallel>], iteration_bounds = array<i64: 2>, scalar_prefetch = 0 : i64, scratch_operands = 1 : i64, tpu.core_type = #tpu.core_type<tc>, window_params = [{transform_indices = @transform_0, window_bounds = array<i64: 1, 256, 32>}, {pipeline_mode = #tpu.pipeline_mode<synchronous>, transform_indices = @transform_1, window_bounds = array<i64: 32, 32>}, {pipeline_mode = #tpu.pipeline_mode<synchronous>, transform_indices = @transform_2, window_bounds = array<i64: 1, 32>}, {pipeline_mode = #tpu.pipeline_mode<synchronous>, transform_indices = @transform_3, window_bounds = array<i64: 9, 32>}, {pipeline_mode = #tpu.pipeline_mode<synchronous>, transform_indices = @transform_4, window_bounds = array<i64: 1, 32>}, {pipeline_mode = #tpu.pipeline_mode<synchronous>, transform_indices = @transform_5, window_bounds = array<i64: 32, 32>}, {pipeline_mode = #tpu.pipeline_mode<synchronous>, transform_indices = @transform_6, window_bounds = array<i64: 1, 32>}, {transform_indices = @transform_7, window_bounds = array<i64: 1, 256, 32>}]} {
    %c0 = arith.constant 0 : index
    %c0_0 = arith.constant 0 : index
    %c0_1 = arith.constant 0 : index
    %0 = vector.load %arg1[%c0, %c0_0, %c0_1] : memref<1x256x32xbf16, #tpu.memory_space<vmem>>, vector<1x256x32xbf16>
    %1 = vector.shape_cast %0 : vector<1x256x32xbf16> to vector<256x32xbf16>
    %c0_2 = arith.constant 0 : index
    %c0_3 = arith.constant 0 : index
    %2 = vector.load %arg2[%c0_2, %c0_3] : memref<32x32xbf16, #tpu.memory_space<vmem>>, vector<32x32xbf16>
    %cst = arith.constant dense<0.000000e+00> : vector<256x32xf32>
    %3 = tpu.matmul %1, %2, %cst {dimension_numbers = #tpu.dot_dimension_numbers<[1], [0], [0], [1], [0, 0, 1, 1], [], []>} : vector<256x32xbf16>, vector<32x32xbf16>, vector<256x32xf32> -> vector<256x32xf32>
    %c0_4 = arith.constant 0 : index
    %c0_5 = arith.constant 0 : index
    %4 = vector.load %arg3[%c0_4, %c0_5] : memref<1x32xf32, #tpu.memory_space<vmem>>, vector<1x32xf32>
    %5 = vector.broadcast %4 : vector<1x32xf32> to vector<256x32xf32>
    %6 = arith.addf %3, %5 : vector<256x32xf32>
    %cst_6 = arith.constant 0.000000e+00 : f32
    %7 = vector.broadcast %cst_6 : f32 to vector<256x32xf32>
    %8 = arith.maximumf %6, %7 : vector<256x32xf32>
    %9 = vector.shape_cast %8 : vector<256x32xf32> to vector<16x16x32xf32>
    %c1 = arith.constant 1 : index
    %c8 = arith.constant 8 : index
    %c0_7 = arith.constant 0 : index
    %10 = vector.load %arg9[%c1, %c8, %c0_7] : memref<18x32x32xf32, #tpu.memory_space<vmem>>, vector<16x16x32xf32>
    tpu.vector_store %arg9[%c1, %c8, %c0_7], %9 {strides = array<i32>} : memref<18x32x32xf32, #tpu.memory_space<vmem>>, vector<16x16x32xf32>,
    %11 = tpu.iota {dimensions = array<i32: 0>} : vector<16x16x1xi32>
    %12 = tpu.iota {dimensions = array<i32: 1>} : vector<16x16x1xi32>
    %cst_8 = arith.constant 0.000000e+00 : f32
    %13 = vector.broadcast %cst_8 : f32 to vector<16x16x32xf32>
    %c1_i32 = arith.constant 1 : i32
    %14 = vector.broadcast %c1_i32 : i32 to vector<16x16x1xi32>
    %15 = arith.cmpi sge, %11, %14 : vector<16x16x1xi32>
    %c1_i32_9 = arith.constant 1 : i32
    %16 = vector.broadcast %c1_i32_9 : i32 to vector<16x16x1xi32>
    %17 = arith.cmpi sge, %12, %16 : vector<16x16x1xi32>
    %c0_10 = arith.constant 0 : index
    %c7 = arith.constant 7 : index
    %c0_11 = arith.constant 0 : index
    %18 = vector.load %arg9[%c0_10, %c7, %c0_11] : memref<18x32x32xf32, #tpu.memory_space<vmem>>, vector<16x16x32xf32>
    %19 = arith.andi %15, %17 : vector<16x16x1xi1>
    %cst_12 = arith.constant 0.000000e+00 : f32
    %20 = vector.shape_cast %19 : vector<16x16x1xi1> to vector<16x16x1xi1>
    %21 = vector.broadcast %20 : vector<16x16x1xi1> to vector<16x16x32xi1>
    %22 = vector.broadcast %cst_12 : f32 to vector<16x16x32xf32>
    %23 = arith.select %21, %18, %22 : vector<16x16x32xi1>, vector<16x16x32xf32>
    %c0_13 = arith.constant 0 : index
    %c0_14 = arith.constant 0 : index
    %24 = vector.load %arg4[%c0_13, %c0_14] : memref<9x32xf32, #tpu.memory_space<vmem>>, vector<1x32xf32>
    %25 = vector.shape_cast %24 : vector<1x32xf32> to vector<1x1x32xf32>
    %26 = vector.broadcast %25 : vector<1x1x32xf32> to vector<16x16x32xf32>
    %27 = arith.mulf %23, %26 : vector<16x16x32xf32>
    %28 = arith.addf %13, %27 : vector<16x16x32xf32>
    %c1_i32_15 = arith.constant 1 : i32
    %29 = vector.broadcast %c1_i32_15 : i32 to vector<16x16x1xi32>
    %30 = arith.cmpi sge, %11, %29 : vector<16x16x1xi32>
    %c0_16 = arith.constant 0 : index
    %c8_17 = arith.constant 8 : index
    %c0_18 = arith.constant 0 : index
    %31 = vector.load %arg9[%c0_16, %c8_17, %c0_18] : memref<18x32x32xf32, #tpu.memory_space<vmem>>, vector<16x16x32xf32>
    %cst_19 = arith.constant 0.000000e+00 : f32
    %32 = vector.shape_cast %30 : vector<16x16x1xi1> to vector<16x16x1xi1>
    %33 = vector.broadcast %32 : vector<16x16x1xi1> to vector<16x16x32xi1>
    %34 = vector.broadcast %cst_19 : f32 to vector<16x16x32xf32>
    %35 = arith.select %33, %31, %34 : vector<16x16x32xi1>, vector<16x16x32xf32>
    %c1_20 = arith.constant 1 : index
    %c0_21 = arith.constant 0 : index
    %36 = vector.load %arg4[%c1_20, %c0_21] : memref<9x32xf32, #tpu.memory_space<vmem>>, vector<1x32xf32>
    %37 = vector.shape_cast %36 : vector<1x32xf32> to vector<1x1x32xf32>
    %38 = vector.broadcast %37 : vector<1x1x32xf32> to vector<16x16x32xf32>
    %39 = arith.mulf %35, %38 : vector<16x16x32xf32>
    %40 = arith.addf %28, %39 : vector<16x16x32xf32>
    %c1_i32_22 = arith.constant 1 : i32
    %41 = vector.broadcast %c1_i32_22 : i32 to vector<16x16x1xi32>
    %42 = arith.cmpi sge, %11, %41 : vector<16x16x1xi32>
    %c15_i32 = arith.constant 15 : i32
    %43 = vector.broadcast %c15_i32 : i32 to vector<16x16x1xi32>
    %44 = arith.cmpi slt, %12, %43 : vector<16x16x1xi32>
    %c0_23 = arith.constant 0 : index
    %c9 = arith.constant 9 : index
    %c0_24 = arith.constant 0 : index
    %45 = vector.load %arg9[%c0_23, %c9, %c0_24] : memref<18x32x32xf32, #tpu.memory_space<vmem>>, vector<16x16x32xf32>
    %46 = arith.andi %42, %44 : vector<16x16x1xi1>
    %cst_25 = arith.constant 0.000000e+00 : f32
    %47 = vector.shape_cast %46 : vector<16x16x1xi1> to vector<16x16x1xi1>
    %48 = vector.broadcast %47 : vector<16x16x1xi1> to vector<16x16x32xi1>
    %49 = vector.broadcast %cst_25 : f32 to vector<16x16x32xf32>
    %50 = arith.select %48, %45, %49 : vector<16x16x32xi1>, vector<16x16x32xf32>
    %c2 = arith.constant 2 : index
    %c0_26 = arith.constant 0 : index
    %51 = vector.load %arg4[%c2, %c0_26] : memref<9x32xf32, #tpu.memory_space<vmem>>, vector<1x32xf32>
    %52 = vector.shape_cast %51 : vector<1x32xf32> to vector<1x1x32xf32>
    %53 = vector.broadcast %52 : vector<1x1x32xf32> to vector<16x16x32xf32>
    %54 = arith.mulf %50, %53 : vector<16x16x32xf32>
    %55 = arith.addf %40, %54 : vector<16x16x32xf32>
    %c1_i32_27 = arith.constant 1 : i32
    %56 = vector.broadcast %c1_i32_27 : i32 to vector<16x16x1xi32>
    %57 = arith.cmpi sge, %12, %56 : vector<16x16x1xi32>
    %c1_28 = arith.constant 1 : index
    %c7_29 = arith.constant 7 : index
    %c0_30 = arith.constant 0 : index
    %58 = vector.load %arg9[%c1_28, %c7_29, %c0_30] : memref<18x32x32xf32, #tpu.memory_space<vmem>>, vector<16x16x32xf32>
    %cst_31 = arith.constant 0.000000e+00 : f32
    %59 = vector.shape_cast %57 : vector<16x16x1xi1> to vector<16x16x1xi1>
    %60 = vector.broadcast %59 : vector<16x16x1xi1> to vector<16x16x32xi1>
    %61 = vector.broadcast %cst_31 : f32 to vector<16x16x32xf32>
    %62 = arith.select %60, %58, %61 : vector<16x16x32xi1>, vector<16x16x32xf32>
    %c3 = arith.constant 3 : index
    %c0_32 = arith.constant 0 : index
    %63 = vector.load %arg4[%c3, %c0_32] : memref<9x32xf32, #tpu.memory_space<vmem>>, vector<1x32xf32>
    %64 = vector.shape_cast %63 : vector<1x32xf32> to vector<1x1x32xf32>
    %65 = vector.broadcast %64 : vector<1x1x32xf32> to vector<16x16x32xf32>
    %66 = arith.mulf %62, %65 : vector<16x16x32xf32>
    %67 = arith.addf %55, %66 : vector<16x16x32xf32>
    %c1_33 = arith.constant 1 : index
    %c8_34 = arith.constant 8 : index
    %c0_35 = arith.constant 0 : index
    %68 = vector.load %arg9[%c1_33, %c8_34, %c0_35] : memref<18x32x32xf32, #tpu.memory_space<vmem>>, vector<16x16x32xf32>
    %c4 = arith.constant 4 : index
    %c0_36 = arith.constant 0 : index
    %69 = vector.load %arg4[%c4, %c0_36] : memref<9x32xf32, #tpu.memory_space<vmem>>, vector<1x32xf32>
    %70 = vector.shape_cast %69 : vector<1x32xf32> to vector<1x1x32xf32>
    %71 = vector.broadcast %70 : vector<1x1x32xf32> to vector<16x16x32xf32>
    %72 = arith.mulf %68, %71 : vector<16x16x32xf32>
    %73 = arith.addf %67, %72 : vector<16x16x32xf32>
    %c15_i32_37 = arith.constant 15 : i32
    %74 = vector.broadcast %c15_i32_37 : i32 to vector<16x16x1xi32>
    %75 = arith.cmpi slt, %12, %74 : vector<16x16x1xi32>
    %c1_38 = arith.constant 1 : index
    %c9_39 = arith.constant 9 : index
    %c0_40 = arith.constant 0 : index
    %76 = vector.load %arg9[%c1_38, %c9_39, %c0_40] : memref<18x32x32xf32, #tpu.memory_space<vmem>>, vector<16x16x32xf32>
    %cst_41 = arith.constant 0.000000e+00 : f32
    %77 = vector.shape_cast %75 : vector<16x16x1xi1> to vector<16x16x1xi1>
    %78 = vector.broadcast %77 : vector<16x16x1xi1> to vector<16x16x32xi1>
    %79 = vector.broadcast %cst_41 : f32 to vector<16x16x32xf32>
    %80 = arith.select %78, %76, %79 : vector<16x16x32xi1>, vector<16x16x32xf32>
    %c5 = arith.constant 5 : index
    %c0_42 = arith.constant 0 : index
    %81 = vector.load %arg4[%c5, %c0_42] : memref<9x32xf32, #tpu.memory_space<vmem>>, vector<1x32xf32>
    %82 = vector.shape_cast %81 : vector<1x32xf32> to vector<1x1x32xf32>
    %83 = vector.broadcast %82 : vector<1x1x32xf32> to vector<16x16x32xf32>
    %84 = arith.mulf %80, %83 : vector<16x16x32xf32>
    %85 = arith.addf %73, %84 : vector<16x16x32xf32>
    %c15_i32_43 = arith.constant 15 : i32
    %86 = vector.broadcast %c15_i32_43 : i32 to vector<16x16x1xi32>
    %87 = arith.cmpi slt, %11, %86 : vector<16x16x1xi32>
    %c1_i32_44 = arith.constant 1 : i32
    %88 = vector.broadcast %c1_i32_44 : i32 to vector<16x16x1xi32>
    %89 = arith.cmpi sge, %12, %88 : vector<16x16x1xi32>
    %c2_45 = arith.constant 2 : index
    %c7_46 = arith.constant 7 : index
    %c0_47 = arith.constant 0 : index
    %90 = vector.load %arg9[%c2_45, %c7_46, %c0_47] : memref<18x32x32xf32, #tpu.memory_space<vmem>>, vector<16x16x32xf32>
    %91 = arith.andi %87, %89 : vector<16x16x1xi1>
    %cst_48 = arith.constant 0.000000e+00 : f32
    %92 = vector.shape_cast %91 : vector<16x16x1xi1> to vector<16x16x1xi1>
    %93 = vector.broadcast %92 : vector<16x16x1xi1> to vector<16x16x32xi1>
    %94 = vector.broadcast %cst_48 : f32 to vector<16x16x32xf32>
    %95 = arith.select %93, %90, %94 : vector<16x16x32xi1>, vector<16x16x32xf32>
    %c6 = arith.constant 6 : index
    %c0_49 = arith.constant 0 : index
    %96 = vector.load %arg4[%c6, %c0_49] : memref<9x32xf32, #tpu.memory_space<vmem>>, vector<1x32xf32>
    %97 = vector.shape_cast %96 : vector<1x32xf32> to vector<1x1x32xf32>
    %98 = vector.broadcast %97 : vector<1x1x32xf32> to vector<16x16x32xf32>
    %99 = arith.mulf %95, %98 : vector<16x16x32xf32>
    %100 = arith.addf %85, %99 : vector<16x16x32xf32>
    %c15_i32_50 = arith.constant 15 : i32
    %101 = vector.broadcast %c15_i32_50 : i32 to vector<16x16x1xi32>
    %102 = arith.cmpi slt, %11, %101 : vector<16x16x1xi32>
    %c2_51 = arith.constant 2 : index
    %c8_52 = arith.constant 8 : index
    %c0_53 = arith.constant 0 : index
    %103 = vector.load %arg9[%c2_51, %c8_52, %c0_53] : memref<18x32x32xf32, #tpu.memory_space<vmem>>, vector<16x16x32xf32>
    %cst_54 = arith.constant 0.000000e+00 : f32
    %104 = vector.shape_cast %102 : vector<16x16x1xi1> to vector<16x16x1xi1>
    %105 = vector.broadcast %104 : vector<16x16x1xi1> to vector<16x16x32xi1>
    %106 = vector.broadcast %cst_54 : f32 to vector<16x16x32xf32>
    %107 = arith.select %105, %103, %106 : vector<16x16x32xi1>, vector<16x16x32xf32>
    %c7_55 = arith.constant 7 : index
    %c0_56 = arith.constant 0 : index
    %108 = vector.load %arg4[%c7_55, %c0_56] : memref<9x32xf32, #tpu.memory_space<vmem>>, vector<1x32xf32>
    %109 = vector.shape_cast %108 : vector<1x32xf32> to vector<1x1x32xf32>
    %110 = vector.broadcast %109 : vector<1x1x32xf32> to vector<16x16x32xf32>
    %111 = arith.mulf %107, %110 : vector<16x16x32xf32>
    %112 = arith.addf %100, %111 : vector<16x16x32xf32>
    %c15_i32_57 = arith.constant 15 : i32
    %113 = vector.broadcast %c15_i32_57 : i32 to vector<16x16x1xi32>
    %114 = arith.cmpi slt, %11, %113 : vector<16x16x1xi32>
    %c15_i32_58 = arith.constant 15 : i32
    %115 = vector.broadcast %c15_i32_58 : i32 to vector<16x16x1xi32>
    %116 = arith.cmpi slt, %12, %115 : vector<16x16x1xi32>
    %c2_59 = arith.constant 2 : index
    %c9_60 = arith.constant 9 : index
    %c0_61 = arith.constant 0 : index
    %117 = vector.load %arg9[%c2_59, %c9_60, %c0_61] : memref<18x32x32xf32, #tpu.memory_space<vmem>>, vector<16x16x32xf32>
    %118 = arith.andi %114, %116 : vector<16x16x1xi1>
    %cst_62 = arith.constant 0.000000e+00 : f32
    %119 = vector.shape_cast %118 : vector<16x16x1xi1> to vector<16x16x1xi1>
    %120 = vector.broadcast %119 : vector<16x16x1xi1> to vector<16x16x32xi1>
    %121 = vector.broadcast %cst_62 : f32 to vector<16x16x32xf32>
    %122 = arith.select %120, %117, %121 : vector<16x16x32xi1>, vector<16x16x32xf32>
    %c8_63 = arith.constant 8 : index
    %c0_64 = arith.constant 0 : index
    %123 = vector.load %arg4[%c8_63, %c0_64] : memref<9x32xf32, #tpu.memory_space<vmem>>, vector<1x32xf32>
    %124 = vector.shape_cast %123 : vector<1x32xf32> to vector<1x1x32xf32>
    %125 = vector.broadcast %124 : vector<1x1x32xf32> to vector<16x16x32xf32>
    %126 = arith.mulf %122, %125 : vector<16x16x32xf32>
    %127 = arith.addf %112, %126 : vector<16x16x32xf32>
    %c0_65 = arith.constant 0 : index
    %c0_66 = arith.constant 0 : index
    %128 = vector.load %arg5[%c0_65, %c0_66] : memref<1x32xf32, #tpu.memory_space<vmem>>, vector<1x32xf32>
    %129 = vector.shape_cast %128 : vector<1x32xf32> to vector<1x1x32xf32>
    %130 = vector.broadcast %129 : vector<1x1x32xf32> to vector<16x16x32xf32>
    %131 = arith.addf %127, %130 : vector<16x16x32xf32>
    %cst_67 = arith.constant 0.000000e+00 : f32
    %132 = vector.broadcast %cst_67 : f32 to vector<16x16x32xf32>
    %133 = arith.maximumf %131, %132 : vector<16x16x32xf32>
    %134 = vector.shape_cast %133 : vector<16x16x32xf32> to vector<256x32xf32>
    %135 = arith.truncf %134 : vector<256x32xf32> to vector<256x32xbf16>
    %c0_68 = arith.constant 0 : index
    %c0_69 = arith.constant 0 : index
    %136 = vector.load %arg6[%c0_68, %c0_69] : memref<32x32xbf16, #tpu.memory_space<vmem>>, vector<32x32xbf16>
    %cst_70 = arith.constant dense<0.000000e+00> : vector<256x32xf32>
    %137 = tpu.matmul %135, %136, %cst_70 {dimension_numbers = #tpu.dot_dimension_numbers<[1], [0], [0], [1], [0, 0, 1, 1], [], []>} : vector<256x32xbf16>, vector<32x32xbf16>, vector<256x32xf32> -> vector<256x32xf32>
    %c0_71 = arith.constant 0 : index
    %c0_72 = arith.constant 0 : index
    %138 = vector.load %arg7[%c0_71, %c0_72] : memref<1x32xf32, #tpu.memory_space<vmem>>, vector<1x32xf32>
    %139 = vector.broadcast %138 : vector<1x32xf32> to vector<256x32xf32>
    %140 = arith.addf %137, %139 : vector<256x32xf32>
    %141 = arith.extf %1 : vector<256x32xbf16> to vector<256x32xf32>
    %142 = arith.addf %140, %141 : vector<256x32xf32>
    %cst_73 = arith.constant 0.000000e+00 : f32
    %143 = vector.broadcast %cst_73 : f32 to vector<256x32xf32>
    %144 = arith.maximumf %142, %143 : vector<256x32xf32>
    %c0_74 = arith.constant 0 : index
    %c0_75 = arith.constant 0 : index
    %c0_76 = arith.constant 0 : index
    %145 = vector.load %arg8[%c0_74, %c0_75, %c0_76] : memref<1x256x32xf32, #tpu.memory_space<vmem>>, vector<1x256x32xf32>
    %146 = vector.shape_cast %145 : vector<1x256x32xf32> to vector<256x32xf32>
    %147 = vector.shape_cast %144 : vector<256x32xf32> to vector<1x256x32xf32>
    tpu.vector_store %arg8[%c0_74, %c0_75, %c0_76], %147 {strides = array<i32>} : memref<1x256x32xf32, #tpu.memory_space<vmem>>, vector<1x256x32xf32>,
    return
  }
  func.func @transform_0(%arg0: i32) -> (i32, i32, i32) {
    %c0_i32 = arith.constant 0 : i32
    %c0_i32_0 = arith.constant 0 : i32
    %c0_i32_1 = arith.constant 0 : i32
    return %arg0, %c0_i32, %c0_i32_0 : i32, i32, i32
  }
  func.func @transform_1(%arg0: i32) -> (i32, i32) {
    %c0_i32 = arith.constant 0 : i32
    %c0_i32_0 = arith.constant 0 : i32
    %c0_i32_1 = arith.constant 0 : i32
    return %c0_i32, %c0_i32_0 : i32, i32
  }
  func.func @transform_2(%arg0: i32) -> (i32, i32) {
    %c0_i32 = arith.constant 0 : i32
    %c0_i32_0 = arith.constant 0 : i32
    %c0_i32_1 = arith.constant 0 : i32
    return %c0_i32, %c0_i32_0 : i32, i32
  }
  func.func @transform_3(%arg0: i32) -> (i32, i32) {
    %c0_i32 = arith.constant 0 : i32
    %c0_i32_0 = arith.constant 0 : i32
    %c0_i32_1 = arith.constant 0 : i32
    return %c0_i32, %c0_i32_0 : i32, i32
  }
  func.func @transform_4(%arg0: i32) -> (i32, i32) {
    %c0_i32 = arith.constant 0 : i32
    %c0_i32_0 = arith.constant 0 : i32
    %c0_i32_1 = arith.constant 0 : i32
    return %c0_i32, %c0_i32_0 : i32, i32
  }
  func.func @transform_5(%arg0: i32) -> (i32, i32) {
    %c0_i32 = arith.constant 0 : i32
    %c0_i32_0 = arith.constant 0 : i32
    %c0_i32_1 = arith.constant 0 : i32
    return %c0_i32, %c0_i32_0 : i32, i32
  }
  func.func @transform_6(%arg0: i32) -> (i32, i32) {
    %c0_i32 = arith.constant 0 : i32
    %c0_i32_0 = arith.constant 0 : i32
    %c0_i32_1 = arith.constant 0 : i32
    return %c0_i32, %c0_i32_0 : i32, i32
  }
  func.func @transform_7(%arg0: i32) -> (i32, i32, i32) {
    %c0_i32 = arith.constant 0 : i32
    %c0_i32_0 = arith.constant 0 : i32
    %c0_i32_1 = arith.constant 0 : i32
    return %arg0, %c0_i32, %c0_i32_0 : i32, i32, i32
  }
}

</mosaic_0001>

<bundles_post_ra>
// kernel: tpu_custom_call.1
= control target key start
LH: loop header
LB: loop body
LE: loop exit
PB: predicated region body
PF: predicated region fallthrough
CT: control target
= control target key end

     0   :  { %12 = vsyncpa [#allocation4], 0  ;;  %s4687_s0 = inlined_call_operand.hbm [shape: bf16[2,256,32], index: 0, kind: input, shape index: {}]   ;;  %s4688_s1 = inlined_call_operand.hbm [shape: bf16[32,32], index: 1, kind: input, shape index: {}]   ;;  %s4689_s2 = inlined_call_operand.hbm [shape: f32[1,32], index: 2, kind: input, shape index: {}]   ;;  %s4690_s3 = inlined_call_operand.hbm [shape: f32[9,32], index: 3, kind: input, shape index: {}]   ;;  %s4691_s4 = inlined_call_operand.hbm [shape: f32[1,32], index: 4, kind: input, shape index: {}]   ;;  %s4692_s5 = inlined_call_operand.hbm [shape: bf16[32,32], index: 5, kind: input, shape index: {}]   ;;  %s4693_s6 = inlined_call_operand.hbm [shape: f32[1,32], index: 6, kind: input, shape index: {}]   ;;  %s4694_s7 = inlined_call_operand.hbm [shape: f32[2,256,32], index: 7, kind: output, shape index: {}]  }
   0x1   :  { %14 = vsyncpa [#allocation4 + $0x1], 0 }
   0x2   :  { %15 = vsyncpa [#allocation7], 0 }
   0x3   :  { %16 = vsyncpa [#allocation10], 0 }
   0x4   :  { %17 = vsyncpa [#allocation13], 0 }
   0x5   :  { %18 = vsyncpa [#allocation5], 0 }
   0x6   :  { %20 = vsyncpa [#allocation5 + $0x1], 0  ;;  %s3292_s24 = smov 0   ;;  %s3294_s25 = smov 0  }
   0x7   :  { %s3296_s26 = smov 0   ;;  %s3298_s27 = smov 0  }
   0x8 LB: > { %s3238_s28 = smov [#allocation6]   ;;  %s3313_s30 = sadd.s32 4294967295, %s3236_s27   ;;  %s3236_s27 = sphi %s3298_s27, %s4722_s27   ;;  %s3232_s26 = sphi %s3296_s26, %s4721_s26   ;;  %s3228_s25 = sphi %s3294_s25, %s4720_s25   ;;  %s3224_s24 = sphi %s3292_s24, %s4719_s24  }
   0x9   : > { %s221_s29 = sshll.u32 %s3238_s28, 4  ;;  %p2586_p0 = scmp.ge.s32.totalorder %s3236_s27, 1  ;;  %s3318_s29 = int_to_ptr.vmem [resolvable:$true] %s221_s29 }
   0xa   : > { %p4695_p1 = scmp.eq.s32.totalorder %s3313_s30, 0  ;;  %p209_p2 = scmp.lt.s32.totalorder %s3236_s27, 3 }
   0xb   : > { %s3239_s9 = smov [#allocation9]   ;;  %s3240_s12 = smov [#allocation12]  }
   0xc   : > { %p3320_p3 = pnand %p2586_p0, %p209_p2  ;;  %s245_s10 = sshll.u32 %s3239_s9, 4  ;;  %s3333_s10 = int_to_ptr.vmem [resolvable:$true] %s245_s10 }
   0xd   : > { %s3335_s13 = sshll.u32 %s3240_s12, 4  ;;  %s2960_s16 = scalar_lea.hbm %s4688_s1, 256  ;;  %s270_s13 = int_to_ptr.vmem [resolvable:$true] %s3335_s13 }
   0xe   : > { %s4699_s8 = scalar_select %p3320_p3, 1, 0 }
   0xf   : > { %p2813_p5 = pneg %p3320_p3  ;;  %p2961_p7 = scmp.ne.s32.totalorder %s4688_s1, %s2960_s16 }
  0x10   : > { %p2967_p11 = scmp.lt.u32.totalorder %s2960_s16, %s4688_s1 }
  0x11   : > { %p3329_p6 = pnand %p2813_p5, %p4695_p1 }
  0x13   : > { %p3345_p8 = pneg %p3329_p6 }
  0x15   : > { %p2963_p9 = pnand %p3345_p8, %p2961_p7 }
  0x17   : > { %p2964_p10 = pneg %p2963_p9 }
  0x19   : > { %p2969_p12 = pnand %p2967_p11, %p2964_p10 }
  0x1b   : > { %2972 = shalt.err (!%p2969_p12)
}
  0x1c   : > { %s2973_s22 = scalar_lea.vmem %s3318_s29, 256  ;;  %p2981_p5 = scmp.lt.s32.totalorder %s3318_s29, %s3318_s29 }
  0x1d   : > { %p2974_p13 = scmp.ne.s32.totalorder %s3318_s29, %s2973_s22  ;;  %p2982_p4 = scmp.lt.s32.totalorder %s2973_s22, %s2973_s22 }
  0x1f   : > { %p2976_p0 = pnand %p2974_p13, %p3345_p8  ;;  %p2983_p7 = por %p2982_p4, %p2981_p5 }
  0x21   : > { %p2977_p2 = pneg %p2976_p0 }
  0x23   : > { %p2984_p9 = pnand %p2983_p7, %p2977_p2 }
  0x25   : > { %2987 = shalt.err (!%p2984_p9)
}
  0x26   : > { %s4697_s23 = smov 64   ;;  %s3242_s28 = smov 4  }
  0x27   : > { %2816 = dma.hbm_to_vmem [thread:$0]  (!%p3329_p6), %s4688_s1, 256, %s3318_s29, [#allocation7], %s4697_s23, %s4697_s23, %s3242_s28  }
  0x28   : > { %s2988_s16 = scalar_lea.hbm %s4690_s3, 256 }
  0x29   : > { %p2989_p4 = scmp.ne.s32.totalorder %s4690_s3, %s2988_s16  ;;  %p2995_p12 = scmp.lt.u32.totalorder %s2988_s16, %s4690_s3 }
  0x2b   : > { %p2991_p10 = pnand %p2989_p4, %p3345_p8 }
  0x2d   : > { %p2992_p11 = pneg %p2991_p10 }
  0x2f   : > { %p2997_p13 = pnand %p2995_p12, %p2992_p11 }
  0x31   : > { %3000 = shalt.err (!%p2997_p13)
}
  0x32   : > { %s3001_s29 = scalar_lea.vmem %s3333_s10, 256  ;;  %p3009_p7 = scmp.lt.s32.totalorder %s3333_s10, %s3333_s10 }
  0x33   : > { %p3002_p0 = scmp.ne.s32.totalorder %s3333_s10, %s3001_s29  ;;  %p3010_p9 = scmp.lt.s32.totalorder %s3001_s29, %s3001_s29 }
  0x35   : > { %p3004_p2 = pnand %p3002_p0, %p3345_p8  ;;  %p3011_p4 = por %p3010_p9, %p3009_p7 }
  0x37   : > { %p3005_p5 = pneg %p3004_p2 }
  0x39   : > { %p3012_p10 = pnand %p3011_p4, %p3005_p5 }
  0x3b   : > { %3015 = shalt.err (!%p3012_p10)
}
  0x3c   : > { %s3243_s22 = smov 128   ;;  %s3244_s9 = smov 8  }
  0x3d   : > { %2822 = dma.hbm_to_vmem [thread:$0]  (!%p3329_p6), %s4690_s3, 256, %s3333_s10, [#allocation10], %s3243_s22, %s3243_s22, %s3244_s9  }
  0x3e   : > { %s3016_s17 = scalar_lea.hbm %s4692_s5, 256 }
  0x3f   : > { %p3017_p11 = scmp.ne.s32.totalorder %s4692_s5, %s3016_s17  ;;  %p3023_p0 = scmp.lt.u32.totalorder %s3016_s17, %s4692_s5 }
  0x41   : > { %p3019_p12 = pnand %p3017_p11, %p3345_p8 }
  0x43   : > { %p3020_p13 = pneg %p3019_p12 }
  0x45   : > { %p3025_p2 = pnand %p3023_p0, %p3020_p13 }
  0x47   : > { %3028 = shalt.err (!%p3025_p2)
}
  0x48   : > { %s3029_s12 = scalar_lea.vmem %s270_s13, 256  ;;  %p3037_p4 = scmp.lt.s32.totalorder %s270_s13, %s270_s13 }
  0x49   : > { %p3030_p5 = scmp.ne.s32.totalorder %s270_s13, %s3029_s12  ;;  %p3038_p10 = scmp.lt.s32.totalorder %s3029_s12, %s3029_s12 }
  0x4b   : > { %p3032_p7 = pnand %p3030_p5, %p3345_p8  ;;  %p3039_p1 = por %p3038_p10, %p3037_p4 }
  0x4d   : > { %p3033_p9 = pneg %p3032_p7 }
  0x4f   : > { %p3040_p3 = pnand %p3039_p1, %p3033_p9 }
  0x51   : > { %3043 = shalt.err (!%p3040_p3)
}
  0x52   : > { %2828 = dma.hbm_to_vmem [thread:$0]  (!%p3329_p6), %s4692_s5, 256, %s270_s13, [#allocation13], %s4697_s23, %s4697_s23, %s3242_s28  }
  0x53   : > { %s3245_s9 = smov [#allocation8]   ;;  %s3246_s15 = smov [#allocation11]  }
  0x54   : > { %s235_s14 = sshll.u32 %s3245_s9, 4  ;;  %s259_s16 = sshll.u32 %s3246_s15, 4  ;;  %s236_s14 = int_to_ptr.vmem [resolvable:$true] %s235_s14  ;;  %s260_s16 = int_to_ptr.vmem [resolvable:$true] %s259_s16 }
  0x55   : > { %s3044_s20 = scalar_lea.hbm %s4689_s2, 16 }
  0x56   : > { %p3045_p1 = scmp.ne.s32.totalorder %s4689_s2, %s3044_s20  ;;  %p3051_p12 = scmp.lt.u32.totalorder %s3044_s20, %s4689_s2 }
  0x58   : > { %p3047_p3 = pnand %p3045_p1, %p3345_p8 }
  0x5a   : > { %p3048_p11 = pneg %p3047_p3 }
  0x5c   : > { %p3053_p13 = pnand %p3051_p12, %p3048_p11 }
  0x5e   : > { %3056 = shalt.err (!%p3053_p13)
}
  0x5f   : > { %s3057_s13 = scalar_lea.vmem %s236_s14, 16  ;;  %s3064_s22 = scalar_lea.vmem %s236_s14, 32 }
  0x60   : > { %p3058_p0 = scmp.ne.s32.totalorder %s236_s14, %s3057_s13  ;;  %p3065_p7 = scmp.lt.s32.totalorder %s236_s14, %s236_s14 }
  0x61   : > { %p3066_p9 = scmp.lt.s32.totalorder %s3064_s22, %s3057_s13 }
  0x62   : > { %p3060_p2 = pnand %p3058_p0, %p3345_p8 }
  0x63   : > { %p3067_p4 = por %p3066_p9, %p3065_p7 }
  0x64   : > { %p3061_p5 = pneg %p3060_p2 }
  0x66   : > { %p3068_p10 = pnand %p3067_p4, %p3061_p5 }
  0x68   : > { %3071 = shalt.err (!%p3068_p10)
}
  0x69   : > { %2819 = dma.hbm_to_vmem [thread:$0]  (!%p3329_p6), %s4689_s2, 16, %s236_s14, [#allocation7]  }
  0x6a   : > { %s3072_s20 = scalar_lea.hbm %s4691_s4, 16 }
  0x6b   : > { %p3073_p1 = scmp.ne.s32.totalorder %s4691_s4, %s3072_s20  ;;  %p3079_p12 = scmp.lt.u32.totalorder %s3072_s20, %s4691_s4 }
  0x6d   : > { %p3075_p3 = pnand %p3073_p1, %p3345_p8 }
  0x6f   : > { %p3076_p11 = pneg %p3075_p3 }
  0x71   : > { %p3081_p13 = pnand %p3079_p12, %p3076_p11 }
  0x73   : > { %3084 = shalt.err (!%p3081_p13)
}
  0x74   : > { %s3085_s13 = scalar_lea.vmem %s260_s16, 16  ;;  %s3092_s14 = scalar_lea.vmem %s260_s16, 32 }
  0x75   : > { %p3086_p0 = scmp.ne.s32.totalorder %s260_s16, %s3085_s13  ;;  %p3093_p7 = scmp.lt.s32.totalorder %s260_s16, %s260_s16 }
  0x76   : > { %p3094_p9 = scmp.lt.s32.totalorder %s3092_s14, %s3085_s13 }
  0x77   : > { %p3088_p2 = pnand %p3086_p0, %p3345_p8 }
  0x78   : > { %p3095_p4 = por %p3094_p9, %p3093_p7 }
  0x79   : > { %p3089_p5 = pneg %p3088_p2 }
  0x7b   : > { %p3096_p10 = pnand %p3095_p4, %p3089_p5 }
  0x7d   : > { %3099 = shalt.err (!%p3096_p10)
}
  0x7e   : > { %2825 = dma.hbm_to_vmem [thread:$0]  (!%p3329_p6), %s4691_s4, 16, %s260_s16, [#allocation10]  }
  0x7f   : > { %s3247_s15 = smov [#allocation14]   ;;  %s3100_s21 = scalar_lea.hbm %s4693_s6, 16 }
  0x80   : > { %s283_s17 = sshll.u32 %s3247_s15, 4  ;;  %p3101_p1 = scmp.ne.s32.totalorder %s4693_s6, %s3100_s21  ;;  %s284_s17 = int_to_ptr.vmem [resolvable:$true] %s283_s17 }
  0x81   : > { %p3107_p12 = scmp.lt.u32.totalorder %s3100_s21, %s4693_s6 }
  0x82   : > { %p3103_p3 = pnand %p3101_p1, %p3345_p8 }
  0x84   : > { %p3104_p11 = pneg %p3103_p3 }
  0x86   : > { %p3109_p13 = pnand %p3107_p12, %p3104_p11 }
  0x88   : > { %3112 = shalt.err (!%p3109_p13)
}
  0x89   : > { %s3113_s16 = scalar_lea.vmem %s284_s17, 16  ;;  %s3120_s14 = scalar_lea.vmem %s284_s17, 32 }
  0x8a   : > { %p3114_p0 = scmp.ne.s32.totalorder %s284_s17, %s3113_s16  ;;  %p3121_p7 = scmp.lt.s32.totalorder %s284_s17, %s284_s17 }
  0x8b   : > { %p3122_p9 = scmp.lt.s32.totalorder %s3120_s14, %s3113_s16 }
  0x8c   : > { %p3116_p2 = pnand %p3114_p0, %p3345_p8 }
  0x8d   : > { %p3123_p4 = por %p3122_p9, %p3121_p7 }
  0x8e   : > { %p3117_p5 = pneg %p3116_p2 }
  0x90   : > { %p3124_p10 = pnand %p3123_p4, %p3117_p5 }
  0x92   : > { %3127 = shalt.err (!%p3124_p10)
}
  0x93   : > { %2831 = dma.hbm_to_vmem [thread:$0]  (!%p3329_p6), %s4693_s6, 16, %s284_s17, [#allocation13]  }
  0x94   : > { %s2585_s19 = sadd.s32 4294967294, %s3236_s27   ;;  %s3470_s11 = sadd.s32 1, %s3236_s27  }
  0x95   : > { %s30_s15 = ssub.s32 %s3236_s27, %s3470_s11  ;;  %s33_s18 = sadd.s32 1, %s3232_s26 }
  0x96   : > { %p31_p8 = scmp.eq.s32.totalorder %s30_s15, 0  ;;  %p40_p1 = scmp.ne.s32.totalorder %s3232_s26, %s3228_s25 }
  0x97   : > { %p41_p3 = scmp.eq.s32.totalorder %s3236_s27, 0  ;;  %p46_p11 = scmp.ne.s32.totalorder %s3228_s25, %s3224_s24 }
  0x98   : > { %s3481_s20 = scalar_select %p31_p8, %s3232_s26, %s33_s18  }
  0x99   : > { %p3483_p12 = por %p41_p3, %p40_p1  ;;  %p4703_p13 = scmp.eq.s32.totalorder %s3313_s30, 0 }
  0x9a   : > { %p196_p0 = scmp.eq.s32.totalorder %s3313_s30, 1  ;;  %p202_p2 = scmp.eq.s32.totalorder %s2585_s19, 1 }
  0x9b   : > { %p3489_p6 = por %p4703_p13, %p46_p11  ;;  %p2846_p5 = scmp.lt.s32.totalorder %s3236_s27, 2 }
  0x9c   : > { %s294_s29 = sand.u32 1, %s3232_s26   ;;  %p3496_p7 = por %p196_p0, %p40_p1 }
  0x9d   : > { %p3500_p9 = por %p202_p2, %p46_p11  ;;  %s2594_s13 = sshll.u32 %s294_s29, 7 }
  0x9e   : > { %s4705_s12 = scalar_select %p3496_p7, 1, 0 }
  0x9f   : > { %s4706_s10 = scalar_select %p3500_p9, 1, 0 }
  0xa0   : > { %s2675_s16 = sshll.u32 %s3236_s27, 11  ;;  %s298_s19 = scalar_lea.vmem [#allocation3], %s2594_s13 }
  0xa1   : > { %s3508_s9 = scalar_lea.hbm %s4687_s0, %s2675_s16  ;;  %s305_s15 = sshll.u32 %s298_s19, 4  ;;  %s3510_s15 = int_to_ptr.vmem [resolvable:$true] %s305_s15 }
  0xa2   : > { %p3514_p4 = pnand %p2846_p5, %p3483_p12  ;;  %s3518_s23 = scalar_lea.sflag [#allocation4], %s294_s29 }
  0xa3   : > { %s3128_s14 = scalar_lea.hbm %s3508_s9, 2048  ;;  %s3133_s21 = scalar_lea.hbm %s4687_s0, 4096 }
  0xa4   : > { %p3129_p10 = scmp.ne.s32.totalorder %s3508_s9, %s3128_s14  ;;  %p3130_p8 = pneg %p3514_p4 }
  0xa5   : > { %p3134_p11 = scmp.lt.u32.totalorder %s3508_s9, %s4687_s0  ;;  %p3135_p12 = scmp.lt.u32.totalorder %s3133_s21, %s3128_s14 }
  0xa6   : > { %p3131_p1 = pnand %p3130_p8, %p3129_p10  ;;  %p3137_p0 = scmp.lt.u32.totalorder %s3128_s14, %s3508_s9 }
  0xa7   : > { %p3136_p13 = por %p3135_p12, %p3134_p11 }
  0xa8   : > { %p3132_p3 = pneg %p3131_p1 }
  0xa9   : > { %p3138_p2 = por %p3137_p0, %p3136_p13 }
  0xab   : > { %p3139_p5 = pnand %p3138_p2, %p3132_p3 }
  0xad   : > { %3142 = shalt.err (!%p3139_p5)
}
  0xae   : > { %s3143_s29 = scalar_lea.vmem %s3510_s15, 2048  ;;  %s3248_s13 = smov [#allocation3]  }
  0xaf   : > { %p3144_p10 = scmp.ne.s32.totalorder %s3510_s15, %s3143_s29  ;;  %s3148_s16 = sshll.u32 %s3248_s13, 4  ;;  %s3149_s16 = int_to_ptr.vmem [resolvable:$false] %s3148_s16 }
  0xb0   : > { %s3150_s22 = scalar_lea.vmem %s3149_s16, 4096  ;;  %p3151_p7 = scmp.lt.s32.totalorder %s3510_s15, %s3149_s16 }
  0xb1   : > { %p3146_p1 = pnand %p3144_p10, %p3130_p8  ;;  %p3152_p11 = scmp.lt.s32.totalorder %s3150_s22, %s3143_s29 }
  0xb3   : > { %p3147_p9 = pneg %p3146_p1  ;;  %p3153_p12 = por %p3152_p11, %p3151_p7 }
  0xb5   : > { %p3154_p13 = pnand %p3153_p12, %p3147_p9 }
  0xb7   : > { %3157 = shalt.err (!%p3154_p13)
}
  0xb8   : > { %s4708_s14 = smov 64   ;;  %p4709_p8 = scmp.ne.s32.totalorder %s4699_s8, 0 }
  0xb9   : > { %2835 = dma.hbm_to_vmem [thread:$0]  (!%p3514_p4), %s3508_s9, 2048, %s3510_s15, %s3518_s23, %s4708_s14, %s4708_s14, %s3242_s28  }
  0xba   : > { %317 = sbr.rel (%p4709_p8) target bundleno = 859 (0x35b), region = 48  ;;  %s3552_s21 = sand.u32 (!%p4709_p8), 1, %s3228_s25  }
  0xbb   : > { %s2598_s19 = sshll.u32 (!%p4709_p8), %s3552_s21, 7  ;;  %s320_s29 = scalar_lea.sflag (!%p4709_p8), [#allocation4], %s3552_s21 }
  0xbc   : > { %s3556_s13 = scalar_lea.vmem (!%p4709_p8), [#allocation3], %s2598_s19 }
  0xc1   : > { %3203 = dma.done.wait (%p3489_p6), %s320_s29, 2048  }
  0xc2   : > { %3205 = vsyncadd (%p3489_p6), %s320_s29, 4294965248  ;;  %p4710_p7 = scmp.eq.s32.totalorder %s3313_s30, 0 }
  0xc4   : > { %3207 = dma.done.wait (%p4710_p7), [#allocation7], 272   ;;  %p4711_p9 = pmov %p4710_p7 }
  0xc5   : > { %p4712_p4 = pmov %p4710_p7 }
  0xc6   : > { %3209 = vsyncadd (%p4711_p9), [#allocation7], 4294967024 }
  0xc7   : > { %3211 = dma.done.wait (%p4712_p4), [#allocation10], 272   ;;  %p4713_p3 = pmov %p4712_p4 }
  0xc9   : > { %3213 = vsyncadd (%p4713_p3), [#allocation10], 4294967024  ;;  %p4714_p0 = pmov %p4713_p3 }
  0xcb   : > { %3215 = dma.done.wait (%p4714_p0), [#allocation13], 272   ;;  %p4715_p2 = pmov %p4714_p0 }
  0xcc   : > { %v2898_v0 = vld [vmem:[#allocation6] sm:$0xff]   ;;  %v2899_v1 = vld [vmem:[#allocation6 + $0x8] sm:$0xff]   ;;  %vm514_vm0 = vcmask 261120   ;;  %v383_v4 = vld [vmem:[%s3556_s13 + $0x10] sm:$0xff]   ;;  %v789_v21 = vlaneseq  ;;  %s2605_s8 = sshll.u32 %s3552_s21, 8  ;;  %s2676_s28 = sshll.u32 %s3313_s30, 12 }
  0xcd   : > { %3217 = vsyncadd (%p4715_p2), [#allocation13], 4294967024  ;;  %2713 = vmatprep.subr.bf16.mxu0 %v2898_v0  ;;  %v379_v2 = vld [vmem:[%s3556_s13] sm:$0xff]   ;;  %v381_v3 = vld [vmem:[%s3556_s13 + $0x8] sm:$0xff]   ;;  %s4528_s23 = scalar_lea.vmem [#allocation15], %s2605_s8  ;;  %s4635_s18 = scalar_lea.hbm %s4694_s7, %s2676_s28 }
  0xce   : > { %2714 = vmatpush3.bf16.msra.mxu0 %v2898_v0  ;;  %2717 = vmatprep.mubr.msk.bf16.mxu0 %vm514_vm0, %v379_v2  ;;  %v385_v5 = vld [vmem:[%s3556_s13 + $0x18] sm:$0xff]   ;;  %v387_v6 = vld [vmem:[%s3556_s13 + $0x20] sm:$0xff]   ;;  %v389_v7 = vld [vmem:[%s3556_s13 + $0x28] sm:$0xff]   ;;  %v3615_v32 = vshrl.u32 %v789_v21, 7  ;;  %s2455_s17 = sshll.u32 %s4528_s23, 4  ;;  %s2442_s30 = scalar_lea.sflag [#allocation5], %s3552_s21  ;;  %s4637_s17 = int_to_ptr.vmem [resolvable:$true] %s2455_s17 }
  0xcf   : > { %2715 = vmatprep.subr.bf16.mxu0 %v2899_v1  ;;  %v391_v8 = vld [vmem:[%s3556_s13 + $0x30] sm:$0xff]   ;;  %v393_v9 = vld [vmem:[%s3556_s13 + $0x38] sm:$0xff]   ;;  %v395_v10 = vld [vmem:[%s3556_s13 + $0x40] sm:$0xff]   ;;  %s3158_s16 = scalar_lea.vmem %s4637_s17, 4096  ;;  %p4716_p5 = scmp.ne.s32.totalorder %s4705_s12, 0 }
  0xd0   : > { %v397_v11 = vld [vmem:[%s3556_s13 + $0x48] sm:$0xff]   ;;  %v399_v12 = vld [vmem:[%s3556_s13 + $0x50] sm:$0xff]   ;;  %v401_v13 = vld [vmem:[%s3556_s13 + $0x58] sm:$0xff]   ;;  %v3627_v41 = vadd.s32 8, %v3615_v32  ;;  %vm792_vm1 = vcmp.ge.s32.totalorder %v3615_v32, 1  ;;  %p3159_p6 = scmp.ne.s32.totalorder %s4637_s17, %s3158_s16  ;;  %s3249_s22 = smov [#allocation15]  }
  0xd1   : > { %v403_v14 = vld [vmem:[%s3556_s13 + $0x60] sm:$0xff]   ;;  %v405_v15 = vld [vmem:[%s3556_s13 + $0x68] sm:$0xff]   ;;  %v407_v16 = vld [vmem:[%s3556_s13 + $0x70] sm:$0xff]   ;;  %s3162_s14 = sshll.u32 %s3249_s22, 4  ;;  %s3163_s14 = int_to_ptr.vmem [resolvable:$false] %s3162_s14 }
  0xd2   : > { %2716 = vmatpush3.bf16.msra.mxu0 %v2899_v1  ;;  %v409_v17 = vld [vmem:[%s3556_s13 + $0x78] sm:$0xff]   ;;  %v2916_v18 = vld [vmem:[#allocation12] sm:$0xff]   ;;  %v2917_v19 = vld [vmem:[#allocation12 + $0x8] sm:$0xff]   ;;  %vm1073_vm2 = vcmp.lt.s32.totalorder %v3627_v41, 15  ;;  %p3160_p10 = pnand %p3159_p6, %p4716_p5  ;;  %s3164_s19 = scalar_lea.vmem %s3163_s14, 8192 }
  0xd3   : > { %2749 = vmatprep.subr.bf16.mxu1 %v2916_v18  ;;  %v3606_v20 = vld [vmem:[#allocation8] ss:$0 sm:$0xff]  ;;  %v3609_v25 = vld [vmem:[#allocation9] ss:$0 sm:$0xff]  ;;  %v3611_v26 = vld [vmem:[#allocation9 + $0x1] ss:$0 sm:$0xff]  ;;  %p3165_p11 = scmp.lt.s32.totalorder %s4637_s17, %s3163_s14  ;;  %p3166_p12 = scmp.lt.s32.totalorder %s3164_s19, %s3158_s16 }
  0xd4   : > { %2750 = vmatpush3.bf16.msra.mxu1 %v2916_v18  ;;  %v875_v35 = vmul.f32 0.0, %v3609_v25  ;;  %v1008_v36 = vmul.f32 0.0, %v3611_v26  ;;  %v3621_v38 = vld [vmem:[#allocation9 + $0x2] ss:$0 sm:$0xff]  ;;  %v3633_v48 = vld [vmem:[#allocation9 + $0x4] ss:$0 sm:$0xff]  ;;  %p3161_p1 = pneg %p3160_p10 }
  0xd5   : > { %2718 = vmatmul.mubr.msk.bf16.vlgmr.msra.gmra.mrb[0].mxu0 %vm514_vm0, %v381_v3  ;;  %2751 = vmatprep.subr.bf16.mxu1 %v2917_v19  ;;  %v1155_v43 = vmul.f32 0.0, %v3621_v38  ;;  %v3635_v49 = vld [vmem:[#allocation9 + $0x7] ss:$0 sm:$0xff]  ;;  %v3638_v53 = vld [vmem:[#allocation9 + $0x3] ss:$0 sm:$0xff]  ;;  %p3167_p13 = por %p3166_p12, %p3165_p11 }
  0xd6   : > { %2721 = vmatprep.mubr.msk.bf16.mxu0 %vm514_vm0, %v383_v4  ;;  %v1040_v42 = vadd.f32 %v1008_v36, %v875_v35  ;;  %v3640_v54 = vld [vmem:[#allocation9 + $0x6] ss:$0 sm:$0xff]  ;;  %v3646_v60 = vld [vmem:[#allocation9 + $0x8] ss:$0 sm:$0xff]  ;;  %v3649_v0 = vld [vmem:[#allocation9 + $0x5] ss:$0 sm:$0xff] }
  0xd7   : > { %p3168_p8 = pnand %p3167_p13, %p3161_p1 }
  0xd8   : > { %2752 = vmatpush3.bf16.msra.mxu1 %v2917_v19  ;;  %v1187_v57 = vadd.f32 %v1155_v43, %v1040_v42 }
  0xdd   : > { %2722 = vmatmul.mubr.msk.bf16.gmra.mrb[4].mxu0 %vm514_vm0, %v385_v5 }
  0xde   : > { %2725 = vmatprep.mubr.msk.bf16.mxu0 %vm514_vm0, %v387_v6 }
  0xe5   : > { %2726 = vmatmul.mubr.msk.bf16.gmra.mrb[8].mxu0 %vm514_vm0, %v389_v7 }
  0xe6   : > { %2729 = vmatprep.mubr.msk.bf16.mxu0 %vm514_vm0, %v391_v8 }
  0xed   : > { %2730 = vmatmul.mubr.msk.bf16.gmra.mrb[12].mxu0 %vm514_vm0, %v393_v9 }
  0xee   : > { %2733 = vmatprep.mubr.msk.bf16.mxu0 %vm514_vm0, %v395_v10 }
  0xf5   : > { %2734 = vmatmul.mubr.msk.bf16.gmra.mrb[16].mxu0 %vm514_vm0, %v397_v11 }
  0xf6   : > { %2737 = vmatprep.mubr.msk.bf16.mxu0 %vm514_vm0, %v399_v12 }
  0xfd   : > { %2738 = vmatmul.mubr.msk.bf16.gmra.mrb[20].mxu0 %vm514_vm0, %v401_v13 }
  0xfe   : > { %2741 = vmatprep.mubr.msk.bf16.mxu0 %vm514_vm0, %v403_v14 }
 0x105   : > { %2742 = vmatmul.mubr.msk.bf16.gmra.mrb[24].mxu0 %vm514_vm0, %v405_v15 }
 0x106   : > { %2745 = vmatprep.mubr.msk.bf16.mxu0 %vm514_vm0, %v407_v16 }
 0x10d   : > { %2746 = vmatmul.mubr.msk.bf16.gmra.mrb[28].mxu0 %vm514_vm0, %v409_v17 }
 0x1a8   : > { %v2719_v22 = vpop.f32.mrb[0].mxu0 }
 0x1a9   : > { %v606_v23 = vadd.f32 %v2719_v22, %v3606_v20  ;;  %v597_v24 = vpop.f32.mrb[1].mxu0 }
 0x1aa   : > { %v598_v27 = vadd.f32 %v3606_v20, %v597_v24  ;;  %v2720_v28 = vpop.f32.mrb[2].mxu0 }
 0x1ab   : > { %v726_v29 = vmax.f32 %v606_v23, 0.0  ;;  %v609_v30 = vadd.f32 %v2720_v28, %v3606_v20  ;;  %v600_v31 = vpop.f32.mrb[3].mxu0 }
 0x1ac   : > { %v724_v33 = vmax.f32 %v598_v27, 0.0  ;;  %v601_v34 = vadd.f32 %v3606_v20, %v600_v31 }
 0x1ad   : > { %759 = vst.msk [vmem:[#allocation2 + $0x48] sm:$0xff] %vm514_vm0, %v726_v29  ;;  %v727_v37 = vmax.f32 %v609_v30, 0.0 }
 0x1ae   : > { %757 = vst.msk [vmem:[#allocation2 + $0x28] sm:$0xff] %vm514_vm0, %v724_v33  ;;  %v725_v39 = vmax.f32 %v601_v34, 0.0 }
 0x1af   : > { %760 = vst.msk [vmem:[#allocation2 + $0x50] sm:$0xff] %vm514_vm0, %v727_v37 }
 0x1b0   : > { %758 = vst.msk [vmem:[#allocation2 + $0x30] sm:$0xff] %vm514_vm0, %v725_v39  ;;  %v2723_v40 = vpop.f32.mrb[4].mxu0 }
 0x1b1   : > { %v622_v44 = vadd.f32 %v2723_v40, %v3606_v20  ;;  %v613_v45 = vpop.f32.mrb[5].mxu0 }
 0x1b2   : > { %v614_v46 = vadd.f32 %v3606_v20, %v613_v45  ;;  %v2724_v47 = vpop.f32.mrb[6].mxu0 }
 0x1b3   : > { %v730_v50 = vmax.f32 %v622_v44, 0.0  ;;  %v625_v51 = vadd.f32 %v2724_v47, %v3606_v20  ;;  %v616_v52 = vpop.f32.mrb[7].mxu0 }
 0x1b4   : > { %v728_v55 = vmax.f32 %v614_v46, 0.0  ;;  %v617_v56 = vadd.f32 %v3606_v20, %v616_v52  ;;  %v1595_v58 = vld [vmem:[#allocation2 + $0x47] sm:$0xff] }
 0x1b5   : > { %v3644_v59 = vld [vmem:[#allocation2 + $0x48] sm:$0xff]  ;;  %763 = vst.msk [vmem:[#allocation2 + $0x88] sm:$0xff] %vm514_vm0, %v730_v50  ;;  %v731_v61 = vmax.f32 %v625_v51, 0.0  ;;  %v3653_v1 = vsel %vm792_vm1, %v1595_v58, 0.0 }
 0x1b6   : > { %v1219_v62 = vld [vmem:[#allocation2 + $0x27] sm:$0xff]  ;;  %v3657_v2 = vmul.f32 %v3635_v49, %v3644_v59  ;;  %v3661_v3 = vmul.f32 %v3633_v48, %v3644_v59  ;;  %761 = vst.msk [vmem:[#allocation2 + $0x68] sm:$0xff] %vm514_vm0, %v728_v55  ;;  %v729_v4 = vmax.f32 %v617_v56, 0.0  ;;  %v3667_v7 = vld [vmem:[#allocation2 + $0x4f] sm:$0xff]  ;;  %v1664_v8 = vmul.f32 %v3640_v54, %v3653_v1 }
 0x1b7   : > { %v1356_v63 = vld [vmem:[#allocation2 + $0x28] sm:$0xff]  ;;  %v1255_v5 = vsel %vm792_vm1, %v1219_v62, 0.0  ;;  %v3671_v9 = vld [vmem:[#allocation2 + $0x50] sm:$0xff]  ;;  %764 = vst.msk [vmem:[#allocation2 + $0x90] sm:$0xff] %vm514_vm0, %v731_v61  ;;  %v1665_v15 = vmul.f32 %v3640_v54, %v3667_v7 }
 0x1b8   : > { %v1393_v6 = vmul.f32 %v3633_v48, %v1356_v63  ;;  %v3673_v10 = vld [vmem:[#allocation2 + $0x49] sm:$0xff]  ;;  %v1292_v12 = vmul.f32 %v3638_v53, %v1255_v5  ;;  %v1798_v16 = vmul.f32 %v3635_v49, %v3671_v9  ;;  %762 = vst.msk [vmem:[#allocation2 + $0x70] sm:$0xff] %vm514_vm0, %v729_v4  ;;  %v2727_v18 = vpop.f32.mrb[8].mxu0  ;;  %v1458_v22 = vld [vmem:[#allocation2 + $0x31] sm:$0xff]  ;;  %v877_v27 = vmul.f32 %v3609_v25, %v1255_v5 }
 0x1b9   : > { %v1220_v11 = vld [vmem:[#allocation2 + $0x2f] sm:$0xff]  ;;  %v3683_v17 = vmul.f32 %v3646_v60, %v3673_v10  ;;  %v638_v28 = vadd.f32 %v2727_v18, %v3606_v20  ;;  %v629_v29 = vpop.f32.mrb[9].mxu0  ;;  %v1494_v31 = vsel %vm1073_vm2, %v1458_v22, 0.0  ;;  %v1010_v51 = vmul.f32 %v3611_v26, %v1356_v63 }
 0x1ba   : > { %v1357_v13 = vld [vmem:[#allocation2 + $0x30] sm:$0xff]  ;;  %v1293_v19 = vmul.f32 %v3638_v53, %v1220_v11  ;;  %v1324_v30 = vadd.f32 %v1292_v12, %v1187_v57  ;;  %v630_v34 = vadd.f32 %v3606_v20, %v629_v29  ;;  %v2728_v35 = vpop.f32.mrb[10].mxu0  ;;  %v1531_v37 = vmul.f32 %v3649_v0, %v1494_v31 }
 0x1bb   : > { %v1457_v14 = vld [vmem:[#allocation2 + $0x29] sm:$0xff]  ;;  %v1394_v21 = vmul.f32 %v3633_v48, %v1357_v13  ;;  %v1862_v24 = vld [vmem:[#allocation2 + $0x51] sm:$0xff]  ;;  %v734_v40 = vmax.f32 %v638_v28, 0.0  ;;  %v641_v42 = vadd.f32 %v2728_v35, %v3606_v20  ;;  %v632_v43 = vpop.f32.mrb[11].mxu0  ;;  %v878_v45 = vmul.f32 %v3609_v25, %v1220_v11 }
 0x1bc   : > { %v1530_v23 = vmul.f32 %v3649_v0, %v1457_v14  ;;  %v3695_v33 = vsel %vm1073_vm2, %v1862_v24, 0.0  ;;  %v1325_v36 = vadd.f32 %v1293_v19, %v1187_v57  ;;  %v1425_v44 = vadd.f32 %v1393_v6, %v1324_v30  ;;  %v3725_v30 = vld [vmem:[#allocation11] ss:$0 sm:$0xff] }
 0x1bd   : > { %v1931_v39 = vmul.f32 %v3646_v60, %v3695_v33  ;;  %v732_v46 = vmax.f32 %v630_v34, 0.0  ;;  %v633_v47 = vadd.f32 %v3606_v20, %v632_v43  ;;  %767 = vst.msk [vmem:[#allocation2 + $0xc8] sm:$0xff] %vm514_vm0, %v734_v40  ;;  %v735_v52 = vmax.f32 %v641_v42, 0.0  ;;  %v1597_v12 = vld [vmem:[#allocation2 + $0x67] sm:$0xff] }
 0x1be   : > { %v1426_v50 = vadd.f32 %v1394_v21, %v1325_v36  ;;  %v1562_v55 = vadd.f32 %v1530_v23, %v1425_v44  ;;  %v1011_v56 = vmul.f32 %v3611_v26, %v1357_v13  ;;  %v1157_v57 = vmul.f32 %v3621_v38, %v1457_v14 }
 0x1bf   : > { %765 = vst.msk [vmem:[#allocation2 + $0xa8] sm:$0xff] %vm514_vm0, %v732_v46  ;;  %v733_v58 = vmax.f32 %v633_v47, 0.0  ;;  %v1042_v62 = vadd.f32 %v1010_v51, %v877_v27  ;;  %v1158_v4 = vmul.f32 %v3621_v38, %v1494_v31  ;;  %768 = vst.msk [vmem:[#allocation2 + $0xd0] sm:$0xff] %vm514_vm0, %v735_v52  ;;  %v1294_v63 = vmul.f32 %v3638_v53, %v3653_v1  ;;  %v3733_v42 = vld [vmem:[#allocation2 + $0x6f] sm:$0xff] }
 0x1c0   : > { %v1563_v61 = vadd.f32 %v1531_v37, %v1426_v50  ;;  %v1696_v5 = vadd.f32 %v1664_v8, %v1562_v55  ;;  %v1043_v6 = vadd.f32 %v1011_v56, %v878_v45  ;;  %v1295_v11 = vmul.f32 %v3638_v53, %v3667_v7  ;;  %v2731_v13 = vpop.f32.mrb[12].mxu0  ;;  %v3737_v46 = vld [vmem:[#allocation2 + $0x68] sm:$0xff]  ;;  %v3739_v47 = vld [vmem:[#allocation2 + $0x70] sm:$0xff] }
 0x1c1   : > { %766 = vst.msk [vmem:[#allocation2 + $0xb0] sm:$0xff] %vm514_vm0, %v733_v58  ;;  %v1189_v18 = vadd.f32 %v1157_v57, %v1042_v62  ;;  %v1396_v19 = vmul.f32 %v3633_v48, %v3671_v9  ;;  %v1532_v21 = vmul.f32 %v3649_v0, %v3673_v10  ;;  %v654_v8 = vadd.f32 %v2731_v13, %v3606_v20  ;;  %v645_v22 = vpop.f32.mrb[13].mxu0  ;;  %v3745_v55 = vld [vmem:[#allocation2 + $0x69] sm:$0xff]  ;;  %v1864_v56 = vld [vmem:[#allocation2 + $0x71] sm:$0xff] }
 0x1c2   : > { %v1697_v14 = vadd.f32 %v1665_v15, %v1563_v61  ;;  %v1829_v23 = vadd.f32 %v3657_v2, %v1696_v5  ;;  %v1190_v24 = vadd.f32 %v1158_v4, %v1043_v6  ;;  %v1533_v27 = vmul.f32 %v3649_v0, %v3695_v33  ;;  %v2732_v29 = vpop.f32.mrb[14].mxu0 }
 0x1c3   : > { %v646_v28 = vadd.f32 %v3606_v20, %v645_v22  ;;  %v1326_v31 = vadd.f32 %v1294_v63, %v1189_v18  ;;  %v3729_v34 = vsel %vm792_vm1, %v1597_v12, 0.0  ;;  %v738_v35 = vmax.f32 %v654_v8, 0.0  ;;  %v648_v37 = vpop.f32.mrb[15].mxu0 }
 0x1c4   : > { %v1830_v15 = vadd.f32 %v1798_v16, %v1697_v14  ;;  %v657_v36 = vadd.f32 %v2732_v29, %v3606_v20  ;;  %v1962_v2 = vadd.f32 %v3683_v17, %v1829_v23  ;;  %v1327_v40 = vadd.f32 %v1295_v11, %v1190_v24 }
 0x1c5   : > { %v736_v43 = vmax.f32 %v646_v28, 0.0  ;;  %v649_v44 = vadd.f32 %v3606_v20, %v648_v37  ;;  %v1427_v45 = vadd.f32 %v3661_v3, %v1326_v31  ;;  %771 = vst.msk [vmem:[#allocation2 + $0x108] sm:$0xff] %vm514_vm0, %v738_v35  ;;  %v1666_v17 = vmul.f32 %v3640_v54, %v3729_v34 }
 0x1c6   : > { %v1963_v16 = vadd.f32 %v1931_v39, %v1830_v15  ;;  %v739_v50 = vmax.f32 %v657_v36, 0.0  ;;  %v2001_v51 = vadd.f32 %v3725_v30, %v1962_v2  ;;  %v1428_v52 = vadd.f32 %v1396_v19, %v1327_v40 }
 0x1c7   : > { %769 = vst.msk [vmem:[#allocation2 + $0xe8] sm:$0xff] %vm514_vm0, %v736_v43  ;;  %v737_v39 = vmax.f32 %v649_v44, 0.0  ;;  %v1564_v57 = vadd.f32 %v1532_v21, %v1427_v45  ;;  %v1667_v58 = vmul.f32 %v3640_v54, %v3733_v42  ;;  %v1799_v4 = vmul.f32 %v3635_v49, %v3737_v46 }
 0x1c8   : > { %v2002_v3 = vadd.f32 %v3725_v30, %v1963_v16  ;;  %772 = vst.msk [vmem:[#allocation2 + $0x110] sm:$0xff] %vm514_vm0, %v739_v50  ;;  %v2033_v61 = vmax.f32 %v2001_v51, 0.0  ;;  %v1565_v62 = vadd.f32 %v1533_v27, %v1428_v52  ;;  %v1800_v5 = vmul.f32 %v3635_v49, %v3739_v47  ;;  %v2735_v6 = vpop.f32.mrb[16].mxu0 }
 0x1c9   : > { %770 = vst.msk [vmem:[#allocation2 + $0xf0] sm:$0xff] %vm514_vm0, %v737_v39  ;;  %v1698_v11 = vadd.f32 %v1666_v17, %v1564_v57  ;;  %v3759_v12 = vsel %vm1073_vm2, %v1864_v56, 0.0  ;;  %v1932_v13 = vmul.f32 %v3646_v60, %v3745_v55  ;;  %v670_v14 = vadd.f32 %v2735_v6, %v3606_v20  ;;  %v661_v18 = vpop.f32.mrb[17].mxu0  ;;  %v1599_v56 = vld [vmem:[#allocation2 + $0x87] sm:$0xff] }
 0x1ca   : > { %v2034_v63 = vmax.f32 %v2002_v3, 0.0  ;;  %v1699_v19 = vadd.f32 %v1667_v58, %v1565_v62  ;;  %v1933_v21 = vmul.f32 %v3646_v60, %v3759_v12  ;;  %v879_v8 = vmul.f32 %v3609_v25, %v3653_v1  ;;  %v2736_v23 = vpop.f32.mrb[18].mxu0 }
 0x1cb   : > { %v662_v22 = vadd.f32 %v3606_v20, %v661_v18  ;;  %v1831_v27 = vadd.f32 %v1799_v4, %v1698_v11  ;;  %v880_v28 = vmul.f32 %v3609_v25, %v3667_v7  ;;  %v742_v29 = vmax.f32 %v670_v14, 0.0  ;;  %v664_v31 = vpop.f32.mrb[19].mxu0  ;;  %v3800_v14 = vld [vmem:[#allocation2 + $0x8f] sm:$0xff] }
 0x1cc   : > { %v2065_v24 = vpack.c.bf16 %v2034_v63, %v2033_v61  ;;  %v673_v15 = vadd.f32 %v2736_v23, %v3606_v20  ;;  %v1832_v35 = vadd.f32 %v1800_v5, %v1699_v19  ;;  %v1012_v36 = vmul.f32 %v3611_v26, %v3644_v59 }
 0x1cd   : > { %v740_v37 = vmax.f32 %v662_v22, 0.0  ;;  %v665_v2 = vadd.f32 %v3606_v20, %v664_v31  ;;  %v1964_v1 = vadd.f32 %v1932_v13, %v1831_v27  ;;  %v1013_v40 = vmul.f32 %v3611_v26, %v3671_v9  ;;  %775 = vst.msk [vmem:[#allocation2 + $0x148] sm:$0xff] %vm514_vm0, %v742_v29  ;;  %v3809_v27 = vld [vmem:[#allocation2 + $0x90] sm:$0xff] }
 0x1ce   : > { %2753 = vmatprep.mubr.msk.bf16.mxu1 %vm514_vm0, %v2065_v24  ;;  %v743_v7 = vmax.f32 %v673_v15, 0.0  ;;  %v1965_v43 = vadd.f32 %v1933_v21, %v1832_v35  ;;  %v1044_v44 = vadd.f32 %v1012_v36, %v879_v8  ;;  %v1159_v16 = vmul.f32 %v3621_v38, %v3673_v10  ;;  %v3807_v24 = vld [vmem:[#allocation2 + $0x88] sm:$0xff]  ;;  %v1866_v36 = vld [vmem:[#allocation2 + $0x91] sm:$0xff] }
 0x1cf   : > { %773 = vst.msk [vmem:[#allocation2 + $0x128] sm:$0xff] %vm514_vm0, %v740_v37  ;;  %v741_v59 = vmax.f32 %v665_v2, 0.0  ;;  %v2003_v45 = vadd.f32 %v3725_v30, %v1964_v1  ;;  %v1045_v50 = vadd.f32 %v1013_v40, %v880_v28  ;;  %v1160_v51 = vmul.f32 %v3621_v38, %v3695_v33  ;;  %v3814_v35 = vld [vmem:[#allocation2 + $0x89] sm:$0xff] }
 0x1d0   : > { %776 = vst.msk [vmem:[#allocation2 + $0x150] sm:$0xff] %vm514_vm0, %v743_v7  ;;  %v2004_v9 = vadd.f32 %v3725_v30, %v1965_v43  ;;  %v1191_v52 = vadd.f32 %v1159_v16, %v1044_v44  ;;  %v1296_v17 = vmul.f32 %v3638_v53, %v3729_v34  ;;  %v1297_v10 = vmul.f32 %v3638_v53, %v3733_v42  ;;  %v2739_v39 = vpop.f32.mrb[20].mxu0 }
 0x1d1   : > { %774 = vst.msk [vmem:[#allocation2 + $0x130] sm:$0xff] %vm514_vm0, %v741_v59  ;;  %v2035_v3 = vmax.f32 %v2003_v45, 0.0  ;;  %v1192_v57 = vadd.f32 %v1160_v51, %v1045_v50  ;;  %v1397_v33 = vmul.f32 %v3633_v48, %v3737_v46  ;;  %v686_v58 = vadd.f32 %v2739_v39, %v3606_v20  ;;  %v677_v62 = vpop.f32.mrb[21].mxu0 }
 0x1d2   : > { %v2036_v61 = vmax.f32 %v2004_v9, 0.0  ;;  %v1328_v4 = vadd.f32 %v1296_v17, %v1191_v52  ;;  %v1398_v5 = vmul.f32 %v3633_v48, %v3739_v47  ;;  %v678_v6 = vadd.f32 %v3606_v20, %v677_v62  ;;  %v2740_v63 = vpop.f32.mrb[22].mxu0 }
 0x1d3   : > { %v1329_v11 = vadd.f32 %v1297_v10, %v1192_v57  ;;  %v1534_v13 = vmul.f32 %v3649_v0, %v3745_v55  ;;  %v3804_v18 = vsel %vm792_vm1, %v1599_v56, 0.0  ;;  %v746_v19 = vmax.f32 %v686_v58, 0.0  ;;  %v680_v22 = vpop.f32.mrb[23].mxu0 }
 0x1d4   : > { %v2066_v21 = vpack.c.bf16 %v2036_v61, %v2035_v3  ;;  %v689_v8 = vadd.f32 %v2740_v63, %v3606_v20  ;;  %v1429_v23 = vadd.f32 %v1397_v33, %v1328_v4  ;;  %v744_v28 = vmax.f32 %v678_v6, 0.0 }
 0x1d5   : > { %v681_v29 = vadd.f32 %v3606_v20, %v680_v22  ;;  %v1430_v15 = vadd.f32 %v1398_v5, %v1329_v11  ;;  %v1535_v31 = vmul.f32 %v3649_v0, %v3759_v12  ;;  %779 = vst.msk [vmem:[#allocation2 + $0x188] sm:$0xff] %vm514_vm0, %v746_v19  ;;  %v1668_v1 = vmul.f32 %v3640_v54, %v3804_v18 }
 0x1d6   : > { %2754 = vmatmul.mubr.msk.bf16.vlgmr.msra.gmra.mrb[0].mxu1 %vm514_vm0, %v2066_v21  ;;  %v747_v37 = vmax.f32 %v689_v8, 0.0  ;;  %v1566_v2 = vadd.f32 %v1534_v13, %v1429_v23  ;;  %v1669_v40 = vmul.f32 %v3640_v54, %v3800_v14  ;;  %777 = vst.msk [vmem:[#allocation2 + $0x168] sm:$0xff] %vm514_vm0, %v744_v28  ;;  %v1801_v44 = vmul.f32 %v3635_v49, %v3807_v24  ;;  %v3856_v21 = vld [vmem:[#allocation2 + $0xaf] sm:$0xff] }
 0x1d7   : > { %v745_v7 = vmax.f32 %v681_v29, 0.0  ;;  %v1567_v43 = vadd.f32 %v1535_v31, %v1430_v15  ;;  %v1802_v16 = vmul.f32 %v3635_v49, %v3809_v27  ;;  %v3830_v45 = vsel %vm1073_vm2, %v1866_v36, 0.0  ;;  %v3858_v8 = vld [vmem:[#allocation2 + $0xa8] sm:$0xff]  ;;  %v3870_v15 = vld [vmem:[#allocation2 + $0xb0] sm:$0xff] }
 0x1d8   : > { %780 = vst.msk [vmem:[#allocation2 + $0x190] sm:$0xff] %vm514_vm0, %v747_v37  ;;  %v1700_v59 = vadd.f32 %v1668_v1, %v1566_v2  ;;  %v1934_v50 = vmul.f32 %v3646_v60, %v3814_v35  ;;  %v881_v51 = vmul.f32 %v3609_v25, %v3729_v34  ;;  %v2743_v52 = vpop.f32.mrb[24].mxu0  ;;  %v882_v17 = vmul.f32 %v3609_v25, %v3733_v42  ;;  %v3875_v1 = vld [vmem:[#allocation2 + $0xa9] sm:$0xff] }
 0x1d9   : > { %778 = vst.msk [vmem:[#allocation2 + $0x170] sm:$0xff] %vm514_vm0, %v745_v7  ;;  %v1701_v9 = vadd.f32 %v1669_v40, %v1567_v43  ;;  %v1014_v10 = vmul.f32 %v3611_v26, %v3737_v46  ;;  %v1015_v56 = vmul.f32 %v3611_v26, %v3739_v47  ;;  %v702_v3 = vadd.f32 %v2743_v52, %v3606_v20  ;;  %v693_v33 = vpop.f32.mrb[25].mxu0  ;;  %v1601_v46 = vld [vmem:[#allocation2 + $0xa7] sm:$0xff]  ;;  %v1868_v40 = vld [vmem:[#allocation2 + $0xb1] sm:$0xff] }
 0x1da   : > { %v1833_v39 = vadd.f32 %v1801_v44, %v1700_v59  ;;  %v1161_v57 = vmul.f32 %v3621_v38, %v3745_v55  ;;  %v1162_v34 = vmul.f32 %v3621_v38, %v3759_v12  ;;  %v1935_v42 = vmul.f32 %v3646_v60, %v3830_v45  ;;  %v2744_v4 = vpop.f32.mrb[26].mxu0 }
 0x1db   : > { %v1834_v58 = vadd.f32 %v1802_v16, %v1701_v9  ;;  %v1046_v61 = vadd.f32 %v1014_v10, %v881_v51  ;;  %v1047_v62 = vadd.f32 %v1015_v56, %v882_v17  ;;  %v750_v47 = vmax.f32 %v702_v3, 0.0  ;;  %v696_v63 = vpop.f32.mrb[27].mxu0 }
 0x1dc   : > { %v1966_v5 = vadd.f32 %v1934_v50, %v1833_v39  ;;  %v1298_v6 = vmul.f32 %v3638_v53, %v3804_v18  ;;  %v1299_v55 = vmul.f32 %v3638_v53, %v3800_v14  ;;  %v1399_v19 = vmul.f32 %v3633_v48, %v3807_v24 }
 0x1dd   : > { %v1967_v11 = vadd.f32 %v1935_v42, %v1834_v58  ;;  %v1193_v12 = vadd.f32 %v1161_v57, %v1046_v61  ;;  %v1194_v13 = vadd.f32 %v1162_v34, %v1047_v62  ;;  %783 = vst.msk [vmem:[#allocation2 + $0x1c8] sm:$0xff] %vm514_vm0, %v750_v47  ;;  %v1400_v23 = vmul.f32 %v3633_v48, %v3809_v27 }
 0x1de   : > { %v2005_v22 = vadd.f32 %v3725_v30, %v1966_v5  ;;  %v1536_v28 = vmul.f32 %v3649_v0, %v3814_v35  ;;  %v3868_v29 = vsel %vm792_vm1, %v1601_v46, 0.0  ;;  %v1537_v2 = vmul.f32 %v3649_v0, %v3830_v45 }
 0x1df   : > { %v2006_v31 = vadd.f32 %v3725_v30, %v1967_v11  ;;  %v1330_v36 = vadd.f32 %v1298_v6, %v1193_v12  ;;  %v1331_v37 = vadd.f32 %v1299_v55, %v1194_v13  ;;  %v1670_v43 = vmul.f32 %v3640_v54, %v3868_v29 }
 0x1e0   : > { %v2037_v7 = vmax.f32 %v2005_v22, 0.0  ;;  %v1671_v44 = vmul.f32 %v3640_v54, %v3856_v21  ;;  %v1803_v16 = vmul.f32 %v3635_v49, %v3858_v8  ;;  %v1804_v9 = vmul.f32 %v3635_v49, %v3870_v15  ;;  %v3885_v52 = vpop.f32.mrb[28].mxu0 }
 0x1e1   : > { %v2038_v59 = vmax.f32 %v2006_v31, 0.0  ;;  %v1431_v50 = vadd.f32 %v1399_v19, %v1330_v36  ;;  %v1432_v51 = vadd.f32 %v1400_v23, %v1331_v37  ;;  %v3889_v17 = vsel %vm1073_vm2, %v1868_v40, 0.0  ;;  %v3895_v3 = vpop.f32.mrb[29].mxu0  ;;  %v1603_v23 = vld [vmem:[#allocation2 + $0xc7] sm:$0xff] }
 0x1e2   : > { %v1936_v10 = vmul.f32 %v3646_v60, %v3875_v1  ;;  %v694_v56 = vadd.f32 %v3606_v20, %v693_v33  ;;  %v705_v39 = vadd.f32 %v2744_v4, %v3606_v20  ;;  %v697_v42 = vadd.f32 %v3606_v20, %v696_v63  ;;  %v3898_v61 = vpop.f32.mrb[30].mxu0  ;;  %v3930_v36 = vld [vmem:[#allocation2 + $0xc8] sm:$0xff] }
 0x1e3   : > { %v2067_v57 = vpack.c.bf16 %v2038_v59, %v2037_v7  ;;  %v1568_v34 = vadd.f32 %v1536_v28, %v1431_v50  ;;  %v1569_v58 = vadd.f32 %v1537_v2, %v1432_v51  ;;  %v883_v5 = vmul.f32 %v3609_v25, %v3804_v18  ;;  %v3904_v33 = vpop.f32.mrb[31].mxu0  ;;  %v3922_v28 = vld [vmem:[#allocation2 + $0xcf] sm:$0xff] }
 0x1e4   : > { %v748_v62 = vmax.f32 %v694_v56, 0.0  ;;  %v751_v46 = vmax.f32 %v705_v39, 0.0  ;;  %v884_v47 = vmul.f32 %v3609_v25, %v3800_v14  ;;  %v749_v55 = vmax.f32 %v697_v42, 0.0 }
 0x1e5   : > { %2757 = vmatprep.mubr.msk.bf16.mxu1 %vm514_vm0, %v2067_v57  ;;  %v1702_v4 = vadd.f32 %v1670_v43, %v1568_v34  ;;  %v1703_v6 = vadd.f32 %v1671_v44, %v1569_v58  ;;  %v1016_v63 = vmul.f32 %v3611_v26, %v3807_v24  ;;  %v1937_v11 = vmul.f32 %v3646_v60, %v3889_v17  ;;  %v3934_v43 = vld [vmem:[#allocation2 + $0xd0] sm:$0xff] }
 0x1e6   : > { %781 = vst.msk [vmem:[#allocation2 + $0x1a8] sm:$0xff] %vm514_vm0, %v748_v62  ;;  %784 = vst.msk [vmem:[#allocation2 + $0x1d0] sm:$0xff] %vm514_vm0, %v751_v46  ;;  %v1017_v14 = vmul.f32 %v3611_v26, %v3809_v27  ;;  %v1163_v18 = vmul.f32 %v3621_v38, %v3814_v35  ;;  %v1164_v12 = vmul.f32 %v3621_v38, %v3830_v45  ;;  %v1870_v44 = vld [vmem:[#allocation2 + $0xd1] sm:$0xff]  ;;  %v3940_v50 = vsel %vm792_vm1, %v1603_v23, 0.0 }
 0x1e7   : > { %v1835_v13 = vadd.f32 %v1803_v16, %v1702_v4  ;;  %v1836_v19 = vadd.f32 %v1804_v9, %v1703_v6  ;;  %782 = vst.msk [vmem:[#allocation2 + $0x1b0] sm:$0xff] %vm514_vm0, %v749_v55  ;;  %v1048_v24 = vadd.f32 %v1016_v63, %v883_v5  ;;  %v1300_v22 = vmul.f32 %v3638_v53, %v3868_v29  ;;  %v3944_v9 = vld [vmem:[#allocation2 + $0xc9] sm:$0xff] }
 0x1e8   : > { %v1049_v31 = vadd.f32 %v1017_v14, %v884_v47  ;;  %v1301_v27 = vmul.f32 %v3638_v53, %v3856_v21  ;;  %v1401_v35 = vmul.f32 %v3633_v48, %v3858_v8  ;;  %v1402_v45 = vmul.f32 %v3633_v48, %v3870_v15 }
 0x1e9   : > { %v1968_v37 = vadd.f32 %v1936_v10, %v1835_v13  ;;  %v1969_v2 = vadd.f32 %v1937_v11, %v1836_v19  ;;  %v1195_v40 = vadd.f32 %v1163_v18, %v1048_v24  ;;  %v1538_v7 = vmul.f32 %v3649_v0, %v3875_v1 }
 0x1ea   : > { %v1196_v16 = vadd.f32 %v1164_v12, %v1049_v31  ;;  %v1539_v59 = vmul.f32 %v3649_v0, %v3889_v17  ;;  %v1673_v51 = vmul.f32 %v3640_v54, %v3922_v28  ;;  %v1805_v57 = vmul.f32 %v3635_v49, %v3930_v36 }
 0x1eb   : > { %v2007_v10 = vadd.f32 %v3725_v30, %v1968_v37  ;;  %v2008_v56 = vadd.f32 %v3725_v30, %v1969_v2  ;;  %v1332_v39 = vadd.f32 %v1300_v22, %v1195_v40  ;;  %v1672_v58 = vmul.f32 %v3640_v54, %v3940_v50 }
 0x1ec   : > { %v1333_v34 = vadd.f32 %v1301_v27, %v1196_v16  ;;  %v1806_v42 = vmul.f32 %v3635_v49, %v3934_v43  ;;  %v3956_v62 = vsel %vm1073_vm2, %v1870_v44, 0.0  ;;  %v1938_v4 = vmul.f32 %v3646_v60, %v3944_v9  ;;  %v3990_v44 = vld [vmem:[#allocation2 + $0xf0] sm:$0xff] }
 0x1ed   : > { %v2039_v46 = vmax.f32 %v2007_v10, 0.0  ;;  %v2040_v5 = vmax.f32 %v2008_v56, 0.0  ;;  %v1433_v47 = vadd.f32 %v1401_v35, %v1332_v39  ;;  %v718_v55 = vadd.f32 %v3885_v52, %v3606_v20  ;;  %v3984_v35 = vld [vmem:[#allocation2 + $0xef] sm:$0xff] }
 0x1ee   : > { %v1434_v6 = vadd.f32 %v1402_v45, %v1333_v34  ;;  %v885_v63 = vmul.f32 %v3609_v25, %v3868_v29  ;;  %v886_v11 = vmul.f32 %v3609_v25, %v3856_v21  ;;  %v1018_v12 = vmul.f32 %v3611_v26, %v3858_v8  ;;  %v1605_v8 = vld [vmem:[#allocation2 + $0xe7] sm:$0xff]  ;;  %v1872_v56 = vld [vmem:[#allocation2 + $0xf1] sm:$0xff] }
 0x1ef   : > { %v2068_v14 = vpack.c.bf16 %v2040_v5, %v2039_v46  ;;  %v1570_v18 = vadd.f32 %v1538_v7, %v1433_v47  ;;  %v1019_v13 = vmul.f32 %v3611_v26, %v3870_v15  ;;  %v754_v24 = vmax.f32 %v718_v55, 0.0  ;;  %v3988_v7 = vld [vmem:[#allocation2 + $0xe8] sm:$0xff] }
 0x1f0   : > { %v1571_v19 = vadd.f32 %v1539_v59, %v1434_v6  ;;  %v1165_v22 = vmul.f32 %v3621_v38, %v3875_v1  ;;  %v1166_v52 = vmul.f32 %v3621_v38, %v3889_v17  ;;  %v1939_v21 = vmul.f32 %v3646_v60, %v3956_v62  ;;  %v4002_v46 = vld [vmem:[#allocation2 + $0xe9] sm:$0xff] }
 0x1f1   : > { %2758 = vmatmul.mubr.msk.bf16.gmra.mrb[4].mxu1 %vm514_vm0, %v2068_v14  ;;  %v1704_v29 = vadd.f32 %v1672_v58, %v1570_v18  ;;  %v1050_v23 = vadd.f32 %v1018_v12, %v885_v63  ;;  %v1051_v31 = vadd.f32 %v1019_v13, %v886_v11  ;;  %787 = vst.msk [vmem:[#allocation2 + $0x208] sm:$0xff] %vm514_vm0, %v754_v24  ;;  %v3998_v10 = vsel %vm792_vm1, %v1605_v8, 0.0 }
 0x1f2   : > { %v1705_v27 = vadd.f32 %v1673_v51, %v1571_v19  ;;  %v1302_v15 = vmul.f32 %v3638_v53, %v3940_v50  ;;  %v1303_v1 = vmul.f32 %v3638_v53, %v3922_v28  ;;  %v1403_v17 = vmul.f32 %v3633_v48, %v3930_v36 }
 0x1f3   : > { %v1837_v45 = vadd.f32 %v1805_v57, %v1704_v29  ;;  %v1197_v37 = vadd.f32 %v1165_v22, %v1050_v23  ;;  %v1198_v2 = vadd.f32 %v1166_v52, %v1051_v31  ;;  %v1404_v40 = vmul.f32 %v3633_v48, %v3934_v43 }
 0x1f4   : > { %v1838_v16 = vadd.f32 %v1806_v42, %v1705_v27  ;;  %v1540_v59 = vmul.f32 %v3649_v0, %v3944_v9  ;;  %v1541_v51 = vmul.f32 %v3649_v0, %v3956_v62  ;;  %v1675_v58 = vmul.f32 %v3640_v54, %v3984_v35 }
 0x1f5   : > { %v1970_v39 = vadd.f32 %v1938_v4, %v1837_v45  ;;  %v1334_v57 = vadd.f32 %v1302_v15, %v1197_v37  ;;  %v1335_v34 = vadd.f32 %v1303_v1, %v1198_v2  ;;  %v1674_v5 = vmul.f32 %v3640_v54, %v3998_v10  ;;  %v1607_v37 = vld [vmem:[#allocation2 + $0x107] sm:$0xff] }
 0x1f6   : > { %v1971_v42 = vadd.f32 %v1939_v21, %v1838_v16  ;;  %v1807_v47 = vmul.f32 %v3635_v49, %v3988_v7  ;;  %v1808_v6 = vmul.f32 %v3635_v49, %v3990_v44  ;;  %v4013_v11 = vsel %vm1073_vm2, %v1872_v56, 0.0  ;;  %v4052_v56 = vld [vmem:[#allocation2 + $0x108] sm:$0xff] }
 0x1f7   : > { %v2009_v55 = vadd.f32 %v3725_v30, %v1970_v39  ;;  %v1435_v4 = vadd.f32 %v1403_v17, %v1334_v57  ;;  %v1436_v63 = vadd.f32 %v1404_v40, %v1335_v34  ;;  %v1940_v18 = vmul.f32 %v3646_v60, %v4002_v46 }
 0x1f8   : > { %v2010_v14 = vadd.f32 %v3725_v30, %v1971_v42  ;;  %v710_v12 = vadd.f32 %v3606_v20, %v3895_v3  ;;  %v721_v13 = vadd.f32 %v3898_v61, %v3606_v20  ;;  %v713_v52 = vadd.f32 %v3606_v20, %v3904_v33  ;;  %v4060_v42 = vld [vmem:[#allocation2 + $0x110] sm:$0xff] }
 0x1f9   : > { %v2041_v19 = vmax.f32 %v2009_v55, 0.0  ;;  %v1572_v24 = vadd.f32 %v1540_v59, %v1435_v4  ;;  %v1573_v22 = vadd.f32 %v1541_v51, %v1436_v63  ;;  %v887_v31 = vmul.f32 %v3609_v25, %v3940_v50  ;;  %v4068_v63 = vld [vmem:[#allocation2 + $0x109] sm:$0xff] }
 0x1fa   : > { %v2042_v29 = vmax.f32 %v2010_v14, 0.0  ;;  %v752_v21 = vmax.f32 %v710_v12, 0.0  ;;  %v755_v23 = vmax.f32 %v721_v13, 0.0  ;;  %v753_v15 = vmax.f32 %v713_v52, 0.0 }
 0x1fb   : > { %v1706_v8 = vadd.f32 %v1674_v5, %v1572_v24  ;;  %v1707_v27 = vadd.f32 %v1675_v58, %v1573_v22  ;;  %v888_v3 = vmul.f32 %v3609_v25, %v3922_v28  ;;  %v1020_v20 = vmul.f32 %v3611_v26, %v3930_v36  ;;  %v1874_v5 = vld [vmem:[#allocation2 + $0x111] sm:$0xff] }
 0x1fc   : > { %v2069_v1 = vpack.c.bf16 %v2042_v29, %v2041_v19  ;;  %785 = vst.msk [vmem:[#allocation2 + $0x1e8] sm:$0xff] %vm514_vm0, %v752_v21  ;;  %788 = vst.msk [vmem:[#allocation2 + $0x210] sm:$0xff] %vm514_vm0, %v755_v23  ;;  %v1021_v61 = vmul.f32 %v3611_v26, %v3934_v43  ;;  %v1167_v33 = vmul.f32 %v3621_v38, %v3944_v9  ;;  %v4058_v58 = vsel %vm792_vm1, %v1607_v37, 0.0  ;;  %v4100_v37 = vld [vmem:[#allocation2 + $0x12f] sm:$0xff] }
 0x1fd   : > { %v1839_v50 = vadd.f32 %v1807_v47, %v1706_v8  ;;  %v1840_v17 = vadd.f32 %v1808_v6, %v1707_v27  ;;  %v1941_v45 = vmul.f32 %v3646_v60, %v4013_v11  ;;  %786 = vst.msk [vmem:[#allocation2 + $0x1f0] sm:$0xff] %vm514_vm0, %v753_v15  ;;  %v1168_v28 = vmul.f32 %v3621_v38, %v3956_v62  ;;  %v4050_v62 = vld [vmem:[#allocation2 + $0x10f] sm:$0xff] }
 0x1fe   : > { %2761 = vmatprep.mubr.msk.bf16.mxu1 %vm514_vm0, %v2069_v1  ;;  %v1052_v36 = vadd.f32 %v1020_v20, %v887_v31  ;;  %v1053_v2 = vadd.f32 %v1021_v61, %v888_v3  ;;  %v1304_v43 = vmul.f32 %v3638_v53, %v3998_v10  ;;  %v1305_v9 = vmul.f32 %v3638_v53, %v3984_v35 }
 0x1ff   : > { %v1972_v40 = vadd.f32 %v1940_v18, %v1839_v50  ;;  %v1973_v16 = vadd.f32 %v1941_v45, %v1840_v17  ;;  %v1405_v59 = vmul.f32 %v3633_v48, %v3988_v7  ;;  %v1406_v51 = vmul.f32 %v3633_v48, %v3990_v44  ;;  %v1609_v17 = vld [vmem:[#allocation2 + $0x127] sm:$0xff] }
 0x200   : > { %v1199_v39 = vadd.f32 %v1167_v33, %v1052_v36  ;;  %v1200_v57 = vadd.f32 %v1168_v28, %v1053_v2  ;;  %v1542_v34 = vmul.f32 %v3649_v0, %v4002_v46  ;;  %v1543_v55 = vmul.f32 %v3649_v0, %v4013_v11 }
 0x201   : > { %v2011_v47 = vadd.f32 %v3725_v30, %v1972_v40  ;;  %v2012_v6 = vadd.f32 %v3725_v30, %v1973_v16  ;;  %v1676_v4 = vmul.f32 %v3640_v54, %v4058_v58  ;;  %v1677_v12 = vmul.f32 %v3640_v54, %v4050_v62  ;;  %v4108_v40 = vld [vmem:[#allocation2 + $0x130] sm:$0xff] }
 0x202   : > { %v1336_v14 = vadd.f32 %v1304_v43, %v1199_v39  ;;  %v1337_v18 = vadd.f32 %v1305_v9, %v1200_v57  ;;  %v1809_v13 = vmul.f32 %v3635_v49, %v4052_v56  ;;  %v1810_v22 = vmul.f32 %v3635_v49, %v4060_v42  ;;  %v4106_v9 = vld [vmem:[#allocation2 + $0x128] sm:$0xff] }
 0x203   : > { %v2043_v19 = vmax.f32 %v2011_v47, 0.0  ;;  %v2044_v24 = vmax.f32 %v2012_v6, 0.0  ;;  %v1906_v52 = vsel %vm1073_vm2, %v1874_v5, 0.0  ;;  %v1942_v23 = vmul.f32 %v3646_v60, %v4068_v63  ;;  %v4115_v57 = vld [vmem:[#allocation2 + $0x129] sm:$0xff] }
 0x204   : > { %v1437_v29 = vadd.f32 %v1405_v59, %v1336_v14  ;;  %v1438_v21 = vadd.f32 %v1406_v51, %v1337_v18  ;;  %v889_v31 = vmul.f32 %v3609_v25, %v3998_v10  ;;  %v890_v27 = vmul.f32 %v3609_v25, %v3984_v35 }
 0x205   : > { %v2070_v8 = vpack.c.bf16 %v2044_v24, %v2043_v19  ;;  %v1022_v15 = vmul.f32 %v3611_v26, %v3988_v7  ;;  %v1023_v3 = vmul.f32 %v3611_v26, %v3990_v44  ;;  %v1169_v61 = vmul.f32 %v3621_v38, %v4002_v46 }
 0x206   : > { %v1574_v1 = vadd.f32 %v1542_v34, %v1437_v29  ;;  %v1575_v20 = vadd.f32 %v1543_v55, %v1438_v21  ;;  %v1170_v33 = vmul.f32 %v3621_v38, %v4013_v11  ;;  %v1943_v10 = vmul.f32 %v3646_v60, %v1906_v52  ;;  %v1876_v34 = vld [vmem:[#allocation2 + $0x131] sm:$0xff] }
 0x207   : > { %2762 = vmatmul.mubr.msk.bf16.gmra.mrb[8].mxu1 %vm514_vm0, %v2070_v8  ;;  %v1054_v50 = vadd.f32 %v1022_v15, %v889_v31  ;;  %v1055_v35 = vadd.f32 %v1023_v3, %v890_v27  ;;  %v1306_v7 = vmul.f32 %v3638_v53, %v4058_v58  ;;  %v1307_v28 = vmul.f32 %v3638_v53, %v4050_v62 }
 0x208   : > { %v1708_v45 = vadd.f32 %v1676_v4, %v1574_v1  ;;  %v1709_v44 = vadd.f32 %v1677_v12, %v1575_v20  ;;  %v1407_v46 = vmul.f32 %v3633_v48, %v4052_v56  ;;  %v1408_v2 = vmul.f32 %v3633_v48, %v4060_v42 }
 0x209   : > { %v1201_v11 = vadd.f32 %v1169_v61, %v1054_v50  ;;  %v1202_v36 = vadd.f32 %v1170_v33, %v1055_v35  ;;  %v1544_v43 = vmul.f32 %v3649_v0, %v4068_v63  ;;  %v1545_v51 = vmul.f32 %v3649_v0, %v1906_v52 }
 0x20a   : > { %v1841_v16 = vadd.f32 %v1809_v13, %v1708_v45  ;;  %v1842_v59 = vadd.f32 %v1810_v22, %v1709_v44  ;;  %v4113_v39 = vsel %vm792_vm1, %v1609_v17, 0.0  ;;  %v1679_v55 = vmul.f32 %v3640_v54, %v4100_v37 }
 0x20b   : > { %v1338_v5 = vadd.f32 %v1306_v7, %v1201_v11  ;;  %v1339_v47 = vadd.f32 %v1307_v28, %v1202_v36  ;;  %v1678_v6 = vmul.f32 %v3640_v54, %v4113_v39  ;;  %v1811_v18 = vmul.f32 %v3635_v49, %v4106_v9 }
 0x20c   : > { %v1974_v4 = vadd.f32 %v1942_v23, %v1841_v16  ;;  %v1975_v14 = vadd.f32 %v1943_v10, %v1842_v59  ;;  %v1812_v12 = vmul.f32 %v3635_v49, %v4108_v40  ;;  %v4127_v24 = vsel %vm1073_vm2, %v1876_v34, 0.0 }
 0x20d   : > { %v1439_v13 = vadd.f32 %v1407_v46, %v1338_v5  ;;  %v1440_v19 = vadd.f32 %v1408_v2, %v1339_v47  ;;  %v1944_v22 = vmul.f32 %v3646_v60, %v4115_v57  ;;  %v891_v23 = vmul.f32 %v3609_v25, %v4058_v58  ;;  %v4165_v2 = vld [vmem:[#allocation2 + $0x150] sm:$0xff] }
 0x20e   : > { %v2013_v29 = vadd.f32 %v3725_v30, %v1974_v4  ;;  %v2014_v21 = vadd.f32 %v3725_v30, %v1975_v14  ;;  %v892_v31 = vmul.f32 %v3609_v25, %v4050_v62  ;;  %v1024_v27 = vmul.f32 %v3611_v26, %v4052_v56  ;;  %v1611_v25 = vld [vmem:[#allocation2 + $0x147] sm:$0xff] }
 0x20f   : > { %v1576_v49 = vadd.f32 %v1544_v43, %v1439_v13  ;;  %v1577_v8 = vadd.f32 %v1545_v51, %v1440_v19  ;;  %v1025_v15 = vmul.f32 %v3611_v26, %v4060_v42  ;;  %v1171_v20 = vmul.f32 %v3621_v38, %v4068_v63  ;;  %v1878_v43 = vld [vmem:[#allocation2 + $0x151] sm:$0xff]  ;;  %v4173_v51 = vld [vmem:[#allocation9 + $0x7] ss:$0 sm:$0xff]  ;;  %v4179_v4 = vld [vmem:[#allocation2 + $0x149] sm:$0xff] }
 0x210   : > { %v2045_v3 = vmax.f32 %v2013_v29, 0.0  ;;  %v2046_v1 = vmax.f32 %v2014_v21, 0.0  ;;  %v1172_v61 = vmul.f32 %v3621_v38, %v1906_v52  ;;  %v1056_v10 = vadd.f32 %v1024_v27, %v891_v23  ;;  %v4150_v38 = vld [vmem:[#allocation2 + $0x14f] sm:$0xff]  ;;  %v4193_v21 = vld [vmem:[#allocation9 + $0x8] ss:$0 sm:$0xff] }
 0x211   : > { %v1710_v33 = vadd.f32 %v1678_v6, %v1576_v49  ;;  %v1711_v58 = vadd.f32 %v1679_v55, %v1577_v8  ;;  %v1057_v50 = vadd.f32 %v1025_v15, %v892_v31  ;;  %v1945_v35 = vmul.f32 %v3646_v60, %v4127_v24  ;;  %v4152_v52 = vld [vmem:[#allocation2 + $0x148] sm:$0xff]  ;;  %v4197_v31 = vld [vmem:[#allocation9 + $0x1] ss:$0 sm:$0xff]  ;;  %v4203_v8 = vld [vmem:[#allocation9 + $0x2] ss:$0 sm:$0xff] }
 0x212   : > { %v2071_v62 = vpack.c.bf16 %v2046_v1, %v2045_v3  ;;  %v1308_v56 = vmul.f32 %v3638_v53, %v4113_v39  ;;  %v1309_v26 = vmul.f32 %v3638_v53, %v4100_v37  ;;  %v1203_v63 = vadd.f32 %v1171_v20, %v1056_v10 }
 0x213   : > { %v1843_v42 = vadd.f32 %v1811_v18, %v1710_v33  ;;  %v1844_v7 = vadd.f32 %v1812_v12, %v1711_v58  ;;  %v1204_v17 = vadd.f32 %v1172_v61, %v1057_v50  ;;  %v1409_v45 = vmul.f32 %v3633_v48, %v4106_v9  ;;  %v1613_v58 = vld [vmem:[#allocation2 + $0x167] sm:$0xff] }
 0x214   : > { %2765 = vmatprep.mubr.msk.bf16.mxu1 %vm514_vm0, %v2071_v62  ;;  %v1410_v60 = vmul.f32 %v3633_v48, %v4108_v40  ;;  %v1546_v44 = vmul.f32 %v3649_v0, %v4115_v57  ;;  %v4163_v53 = vsel %vm792_vm1, %v1611_v25, 0.0  ;;  %v1340_v11 = vadd.f32 %v1308_v56, %v1203_v63  ;;  %v4218_v25 = vld [vmem:[#allocation9 + $0x4] ss:$0 sm:$0xff]  ;;  %v4230_v63 = vld [vmem:[#allocation2 + $0x168] sm:$0xff] }
 0x215   : > { %v1976_v28 = vadd.f32 %v1944_v22, %v1843_v42  ;;  %v1977_v46 = vadd.f32 %v1945_v35, %v1844_v7  ;;  %v1341_v36 = vadd.f32 %v1309_v26, %v1204_v17  ;;  %v1547_v16 = vmul.f32 %v3649_v0, %v4127_v24  ;;  %v4222_v62 = vld [vmem:[#allocation2 + $0x16f] sm:$0xff]  ;;  %v4226_v42 = vld [vmem:[#allocation9 + $0x5] ss:$0 sm:$0xff] }
 0x216   : > { %v1680_v48 = vmul.f32 %v3640_v54, %v4163_v53  ;;  %v1681_v59 = vmul.f32 %v3640_v54, %v4150_v38  ;;  %v1813_v34 = vmul.f32 %v4173_v51, %v4152_v52  ;;  %v1441_v6 = vadd.f32 %v1409_v45, %v1340_v11  ;;  %v4187_v54 = vld [vmem:[#allocation9] ss:$0 sm:$0xff] }
 0x217   : > { %v2015_v5 = vadd.f32 %v3725_v30, %v1976_v28  ;;  %v2016_v47 = vadd.f32 %v3725_v30, %v1977_v46  ;;  %v1442_v55 = vadd.f32 %v1410_v60, %v1341_v36  ;;  %v1814_v0 = vmul.f32 %v4173_v51, %v4165_v2  ;;  %v4232_v17 = vld [vmem:[#allocation2 + $0x170] sm:$0xff] }
 0x218   : > { %v4185_v14 = vsel %vm1073_vm2, %v1878_v43, 0.0  ;;  %v893_v18 = vmul.f32 %v4187_v54, %v4113_v39  ;;  %v894_v12 = vmul.f32 %v4187_v54, %v4100_v37  ;;  %v1578_v22 = vadd.f32 %v1546_v44, %v1441_v6  ;;  %v4240_v46 = vld [vmem:[#allocation2 + $0x169] sm:$0xff]  ;;  %v1880_v11 = vld [vmem:[#allocation2 + $0x171] sm:$0xff] }
 0x219   : > { %v2047_v13 = vmax.f32 %v2015_v5, 0.0  ;;  %v2048_v19 = vmax.f32 %v2016_v47, 0.0  ;;  %v1579_v29 = vadd.f32 %v1547_v16, %v1442_v55  ;;  %v1946_v23 = vmul.f32 %v4193_v21, %v4179_v4  ;;  %v4242_v16 = vld [vmem:[#allocation9 + $0x6] ss:$0 sm:$0xff] }
 0x21a   : > { %v1026_v49 = vmul.f32 %v4197_v31, %v4106_v9  ;;  %v1027_v39 = vmul.f32 %v4197_v31, %v4108_v40  ;;  %v1173_v37 = vmul.f32 %v4203_v8, %v4115_v57  ;;  %v1712_v15 = vadd.f32 %v1680_v48, %v1578_v22  ;;  %v4211_v9 = vld [vmem:[#allocation9 + $0x3] ss:$0 sm:$0xff] }
 0x21b   : > { %v2072_v27 = vpack.c.bf16 %v2048_v19, %v2047_v13  ;;  %v1713_v3 = vadd.f32 %v1681_v59, %v1579_v29  ;;  %v1174_v1 = vmul.f32 %v4203_v8, %v4127_v24  ;;  %v1947_v20 = vmul.f32 %v4193_v21, %v4185_v14 }
 0x21c   : > { %v1058_v61 = vadd.f32 %v1026_v49, %v893_v18  ;;  %v1059_v33 = vadd.f32 %v1027_v39, %v894_v12  ;;  %v1310_v40 = vmul.f32 %v4211_v9, %v4163_v53  ;;  %v1845_v57 = vadd.f32 %v1813_v34, %v1712_v15 }
 0x21d   : > { %2766 = vmatmul.mubr.msk.bf16.gmra.mrb[12].mxu1 %vm514_vm0, %v2072_v27  ;;  %v1846_v10 = vadd.f32 %v1814_v0, %v1713_v3  ;;  %v1311_v50 = vmul.f32 %v4211_v9, %v4150_v38  ;;  %v1411_v24 = vmul.f32 %v4218_v25, %v4152_v52  ;;  %v1412_v26 = vmul.f32 %v4218_v25, %v4165_v2 }
 0x21e   : > { %v1205_v35 = vadd.f32 %v1173_v37, %v1058_v61  ;;  %v1206_v56 = vadd.f32 %v1174_v1, %v1059_v33  ;;  %v1548_v7 = vmul.f32 %v4226_v42, %v4179_v4  ;;  %v1978_v45 = vadd.f32 %v1946_v23, %v1845_v57  ;;  %v1615_v61 = vld [vmem:[#allocation2 + $0x187] sm:$0xff]  ;;  %v4272_v33 = vld [vmem:[#allocation2 + $0x18f] sm:$0xff] }
 0x21f   : > { %v1979_v60 = vadd.f32 %v1947_v20, %v1846_v10  ;;  %v1549_v44 = vmul.f32 %v4226_v42, %v4185_v14  ;;  %v4238_v28 = vsel %vm792_vm1, %v1613_v58, 0.0  ;;  %v1683_v59 = vmul.f32 %v4242_v16, %v4222_v62 }
 0x220   : > { %v1342_v36 = vadd.f32 %v1310_v40, %v1205_v35  ;;  %v1343_v43 = vadd.f32 %v1311_v50, %v1206_v56  ;;  %v1682_v48 = vmul.f32 %v4242_v16, %v4238_v28  ;;  %v2017_v34 = vadd.f32 %v3725_v30, %v1978_v45  ;;  %v4282_v50 = vld [vmem:[#allocation2 + $0x188] sm:$0xff]  ;;  %v1882_v35 = vld [vmem:[#allocation2 + $0x191] sm:$0xff] }
 0x221   : > { %v2018_v5 = vadd.f32 %v3725_v30, %v1979_v60  ;;  %v1815_v47 = vmul.f32 %v4173_v51, %v4230_v63  ;;  %v1816_v6 = vmul.f32 %v4173_v51, %v4232_v17  ;;  %v1912_v18 = vsel %vm1073_vm2, %v1880_v11, 0.0 }
 0x222   : > { %v1443_v55 = vadd.f32 %v1411_v24, %v1342_v36  ;;  %v1444_v0 = vadd.f32 %v1412_v26, %v1343_v43  ;;  %v1948_v12 = vmul.f32 %v4193_v21, %v4240_v46  ;;  %v2049_v13 = vmax.f32 %v2017_v34, 0.0  ;;  %v4284_v24 = vld [vmem:[#allocation2 + $0x190] sm:$0xff] }
 0x223   : > { %v2050_v19 = vmax.f32 %v2018_v5, 0.0  ;;  %v895_v22 = vmul.f32 %v4187_v54, %v4163_v53  ;;  %v896_v30 = vmul.f32 %v4187_v54, %v4150_v38  ;;  %v1028_v49 = vmul.f32 %v4197_v31, %v4152_v52  ;;  %v4295_v43 = vld [vmem:[#allocation2 + $0x189] sm:$0xff] }
 0x224   : > { %v1580_v29 = vadd.f32 %v1548_v7, %v1443_v55  ;;  %v1581_v23 = vadd.f32 %v1549_v44, %v1444_v0  ;;  %v1029_v39 = vmul.f32 %v4197_v31, %v4165_v2  ;;  %v1175_v27 = vmul.f32 %v4203_v8, %v4179_v4 }
 0x225   : > { %v2073_v37 = vpack.c.bf16 %v2050_v19, %v2049_v13  ;;  %v1176_v15 = vmul.f32 %v4203_v8, %v4185_v14  ;;  %v1312_v53 = vmul.f32 %v4211_v9, %v4238_v28  ;;  %v1060_v1 = vadd.f32 %v1028_v49, %v895_v22 }
 0x226   : > { %v1714_v3 = vadd.f32 %v1682_v48, %v1580_v29  ;;  %v1715_v38 = vadd.f32 %v1683_v59, %v1581_v23  ;;  %v1061_v20 = vadd.f32 %v1029_v39, %v896_v30  ;;  %v1949_v52 = vmul.f32 %v4193_v21, %v1912_v18 }
 0x227   : > { %2769 = vmatprep.mubr.msk.bf16.mxu1 %vm514_vm0, %v2073_v37  ;;  %v1313_v2 = vmul.f32 %v4211_v9, %v4222_v62  ;;  %v1413_v4 = vmul.f32 %v4218_v25, %v4230_v63  ;;  %v1414_v14 = vmul.f32 %v4218_v25, %v4232_v17  ;;  %v1207_v57 = vadd.f32 %v1175_v27, %v1060_v1 }
 0x228   : > { %v1847_v40 = vadd.f32 %v1815_v47, %v1714_v3  ;;  %v1848_v58 = vadd.f32 %v1816_v6, %v1715_v38  ;;  %v1208_v10 = vadd.f32 %v1176_v15, %v1061_v20  ;;  %v1550_v56 = vmul.f32 %v4226_v42, %v4240_v46  ;;  %v4307_v47 = vld [vmem:[#allocation11] ss:$0 sm:$0xff] }
 0x229   : > { %v1551_v26 = vmul.f32 %v4226_v42, %v1912_v18  ;;  %v4291_v7 = vsel %vm792_vm1, %v1615_v61, 0.0  ;;  %v1685_v45 = vmul.f32 %v4242_v16, %v4272_v33  ;;  %v1344_v11 = vadd.f32 %v1312_v53, %v1207_v57 }
 0x22a   : > { %v1980_v60 = vadd.f32 %v1948_v12, %v1847_v40  ;;  %v1981_v44 = vadd.f32 %v1949_v52, %v1848_v58  ;;  %v1345_v36 = vadd.f32 %v1313_v2, %v1208_v10  ;;  %v1684_v48 = vmul.f32 %v4242_v16, %v4291_v7 }
 0x22b   : > { %v1817_v59 = vmul.f32 %v4173_v51, %v4282_v50  ;;  %v1818_v34 = vmul.f32 %v4173_v51, %v4284_v24  ;;  %v4305_v5 = vsel %vm1073_vm2, %v1882_v35, 0.0  ;;  %v1445_v0 = vadd.f32 %v1413_v4, %v1344_v11  ;;  %v4335_v4 = vld [vmem:[#allocation2 + $0x1af] sm:$0xff] }
 0x22c   : > { %v2019_v6 = vadd.f32 %v4307_v47, %v1980_v60  ;;  %v2020_v55 = vadd.f32 %v4307_v47, %v1981_v44  ;;  %v1446_v12 = vadd.f32 %v1414_v14, %v1345_v36  ;;  %v1950_v13 = vmul.f32 %v4193_v21, %v4295_v43  ;;  %v4337_v14 = vld [vmem:[#allocation2 + $0x1a8] sm:$0xff]  ;;  %v4345_v35 = vld [vmem:[#allocation2 + $0x1b0] sm:$0xff] }
 0x22d   : > { %v897_v19 = vmul.f32 %v4187_v54, %v4238_v28  ;;  %v898_v22 = vmul.f32 %v4187_v54, %v4222_v62  ;;  %v1030_v30 = vmul.f32 %v4197_v31, %v4230_v63  ;;  %v1582_v49 = vadd.f32 %v1550_v56, %v1445_v0  ;;  %v1617_v63 = vld [vmem:[#allocation2 + $0x1a7] sm:$0xff]  ;;  %v1884_v56 = vld [vmem:[#allocation2 + $0x1b1] sm:$0xff] }
 0x22e   : > { %v2051_v29 = vmax.f32 %v2019_v6, 0.0  ;;  %v2052_v23 = vmax.f32 %v2020_v55, 0.0  ;;  %v1583_v39 = vadd.f32 %v1551_v26, %v1446_v12  ;;  %v1031_v37 = vmul.f32 %v4197_v31, %v4232_v17  ;;  %v4351_v11 = vld [vmem:[#allocation2 + $0x1a9] sm:$0xff] }
 0x22f   : > { %v1062_v27 = vadd.f32 %v1030_v30, %v897_v19  ;;  %v1177_v15 = vmul.f32 %v4203_v8, %v4240_v46  ;;  %v1178_v53 = vmul.f32 %v4203_v8, %v1912_v18  ;;  %v1716_v3 = vadd.f32 %v1684_v48, %v1582_v49 }
 0x230   : > { %v2074_v28 = vpack.c.bf16 %v2052_v23, %v2051_v29  ;;  %v1717_v38 = vadd.f32 %v1685_v45, %v1583_v39  ;;  %v1951_v62 = vmul.f32 %v4193_v21, %v4305_v5  ;;  %v1063_v1 = vadd.f32 %v1031_v37, %v898_v22 }
 0x231   : > { %v1209_v20 = vadd.f32 %v1177_v15, %v1062_v27  ;;  %v1314_v61 = vmul.f32 %v4211_v9, %v4291_v7  ;;  %v1315_v17 = vmul.f32 %v4211_v9, %v4272_v33  ;;  %v1849_v46 = vadd.f32 %v1817_v59, %v1716_v3 }
 0x232   : > { %2770 = vmatmul.mubr.msk.bf16.gmra.mrb[16].mxu1 %vm514_vm0, %v2074_v28  ;;  %v1850_v52 = vadd.f32 %v1818_v34, %v1717_v38  ;;  %v1415_v18 = vmul.f32 %v4218_v25, %v4282_v50  ;;  %v1416_v2 = vmul.f32 %v4218_v25, %v4284_v24  ;;  %v1210_v40 = vadd.f32 %v1178_v53, %v1063_v1  ;;  %v1619_v1 = vld [vmem:[#allocation2 + $0x1c7] sm:$0xff] }
 0x233   : > { %v1346_v58 = vadd.f32 %v1314_v61, %v1209_v20  ;;  %v1552_v57 = vmul.f32 %v4226_v42, %v4295_v43  ;;  %v4343_v10 = vsel %vm792_vm1, %v1617_v63, 0.0  ;;  %v1982_v26 = vadd.f32 %v1950_v13, %v1849_v46  ;;  %v4385_v61 = vld [vmem:[#allocation2 + $0x1cf] sm:$0xff] }
 0x234   : > { %v1983_v45 = vadd.f32 %v1951_v62, %v1850_v52  ;;  %v1553_v60 = vmul.f32 %v4226_v42, %v4305_v5  ;;  %v1686_v44 = vmul.f32 %v4242_v16, %v4343_v10  ;;  %v1347_v36 = vadd.f32 %v1315_v17, %v1210_v40 }
 0x235   : > { %v1447_v48 = vadd.f32 %v1415_v18, %v1346_v58  ;;  %v1687_v59 = vmul.f32 %v4242_v16, %v4335_v4  ;;  %v1819_v34 = vmul.f32 %v4173_v51, %v4337_v14  ;;  %v2021_v6 = vadd.f32 %v4307_v47, %v1982_v26  ;;  %v4389_v18 = vld [vmem:[#allocation2 + $0x1c8] sm:$0xff]  ;;  %v1886_v26 = vld [vmem:[#allocation2 + $0x1d1] sm:$0xff] }
 0x236   : > { %v2022_v55 = vadd.f32 %v4307_v47, %v1983_v45  ;;  %v1820_v0 = vmul.f32 %v4173_v51, %v4345_v35  ;;  %v1916_v12 = vsel %vm1073_vm2, %v1884_v56, 0.0  ;;  %v1448_v13 = vadd.f32 %v1416_v2, %v1347_v36  ;;  %v4391_v2 = vld [vmem:[#allocation2 + $0x1d0] sm:$0xff] }
 0x237   : > { %v1584_v19 = vadd.f32 %v1552_v57, %v1447_v48  ;;  %v1952_v22 = vmul.f32 %v4193_v21, %v4351_v11  ;;  %v899_v30 = vmul.f32 %v4187_v54, %v4291_v7  ;;  %v2053_v29 = vmax.f32 %v2021_v6, 0.0 }
 0x238   : > { %v2054_v23 = vmax.f32 %v2022_v55, 0.0  ;;  %v900_v49 = vmul.f32 %v4187_v54, %v4272_v33  ;;  %v1032_v39 = vmul.f32 %v4197_v31, %v4282_v50  ;;  %v1585_v37 = vadd.f32 %v1553_v60, %v1448_v13 }
 0x239   : > { %v1718_v27 = vadd.f32 %v1686_v44, %v1584_v19  ;;  %v1033_v15 = vmul.f32 %v4197_v31, %v4284_v24  ;;  %v1179_v53 = vmul.f32 %v4203_v8, %v4295_v43  ;;  %v1180_v7 = vmul.f32 %v4203_v8, %v4305_v5  ;;  %v1885_v19 = vld [vmem:[#allocation2 + $0x1c9] sm:$0xff] }
 0x23a   : > { %v2075_v28 = vpack.c.bf16 %v2054_v23, %v2053_v29  ;;  %v1064_v3 = vadd.f32 %v1032_v39, %v899_v30  ;;  %v1316_v38 = vmul.f32 %v4211_v9, %v4343_v10  ;;  %v1719_v33 = vadd.f32 %v1687_v59, %v1585_v37 }
 0x23b   : > { %v1851_v62 = vadd.f32 %v1819_v34, %v1718_v27  ;;  %v1065_v63 = vadd.f32 %v1033_v15, %v900_v49  ;;  %v1317_v50 = vmul.f32 %v4211_v9, %v4335_v4  ;;  %v1953_v24 = vmul.f32 %v4193_v21, %v1916_v12 }
 0x23c   : > { %2773 = vmatprep.mubr.msk.bf16.mxu1 %vm514_vm0, %v2075_v28  ;;  %v1211_v43 = vadd.f32 %v1179_v53, %v1064_v3  ;;  %v1417_v20 = vmul.f32 %v4218_v25, %v4337_v14  ;;  %v1852_v5 = vadd.f32 %v1820_v0, %v1719_v33  ;;  %v1418_v52 = vmul.f32 %v4218_v25, %v4345_v35 }
 0x23d   : > { %v1984_v17 = vadd.f32 %v1952_v22, %v1851_v62  ;;  %v1212_v46 = vadd.f32 %v1180_v7, %v1065_v63  ;;  %v1554_v58 = vmul.f32 %v4226_v42, %v4351_v11  ;;  %v1555_v57 = vmul.f32 %v4226_v42, %v1916_v12 }
 0x23e   : > { %v1348_v40 = vadd.f32 %v1316_v38, %v1211_v43  ;;  %v4398_v56 = vsel %vm792_vm1, %v1619_v1, 0.0  ;;  %v1985_v45 = vadd.f32 %v1953_v24, %v1852_v5  ;;  %v1689_v36 = vmul.f32 %v4242_v16, %v4385_v61 }
 0x23f   : > { %v2023_v60 = vadd.f32 %v4307_v47, %v1984_v17  ;;  %v1349_v44 = vadd.f32 %v1317_v50, %v1212_v46  ;;  %v1688_v59 = vmul.f32 %v4242_v16, %v4398_v56  ;;  %v1821_v34 = vmul.f32 %v4173_v51, %v4389_v18  ;;  %v4429_v50 = vld [vmem:[#allocation2 + $0x1ef] sm:$0xff] }
 0x240   : > { %v1449_v48 = vadd.f32 %v1417_v20, %v1348_v40  ;;  %v1822_v6 = vmul.f32 %v4173_v51, %v4391_v2  ;;  %v2024_v55 = vadd.f32 %v4307_v47, %v1985_v45  ;;  %v1918_v22 = vsel %vm1073_vm2, %v1886_v26, 0.0  ;;  %v4436_v20 = vld [vmem:[#allocation2 + $0x1e8] sm:$0xff]  ;;  %v4443_v40 = vld [vmem:[#allocation2 + $0x1f0] sm:$0xff] }
 0x241   : > { %v2055_v0 = vmax.f32 %v2023_v60, 0.0  ;;  %v1450_v13 = vadd.f32 %v1418_v52, %v1349_v44  ;;  %v901_v29 = vmul.f32 %v4187_v54, %v4343_v10  ;;  %v902_v23 = vmul.f32 %v4187_v54, %v4335_v4 }
 0x242   : > { %v1586_v30 = vadd.f32 %v1554_v58, %v1449_v48  ;;  %v1034_v49 = vmul.f32 %v4197_v31, %v4337_v14  ;;  %v2056_v39 = vmax.f32 %v2024_v55, 0.0  ;;  %v1035_v27 = vmul.f32 %v4197_v31, %v4345_v35  ;;  %v1621_v14 = vld [vmem:[#allocation2 + $0x1e7] sm:$0xff]  ;;  %v1888_v58 = vld [vmem:[#allocation2 + $0x1f1] sm:$0xff] }
 0x243   : > { %v1587_v37 = vadd.f32 %v1555_v57, %v1450_v13  ;;  %v1181_v15 = vmul.f32 %v4203_v8, %v4351_v11  ;;  %v1954_v28 = vmul.f32 %v4193_v21, %v1885_v19  ;;  %v1182_v10 = vmul.f32 %v4203_v8, %v1916_v12 }
 0x244   : > { %v1720_v53 = vadd.f32 %v1688_v59, %v1586_v30  ;;  %v1066_v3 = vadd.f32 %v1034_v49, %v901_v29  ;;  %v2076_v7 = vpack.c.bf16 %v2056_v39, %v2055_v0  ;;  %v1955_v4 = vmul.f32 %v4193_v21, %v1918_v22 }
 0x245   : > { %v1721_v38 = vadd.f32 %v1689_v36, %v1587_v37  ;;  %v1067_v33 = vadd.f32 %v1035_v27, %v902_v23  ;;  %v1318_v35 = vmul.f32 %v4211_v9, %v4398_v56  ;;  %v1319_v11 = vmul.f32 %v4211_v9, %v4385_v61  ;;  %v1887_v37 = vld [vmem:[#allocation2 + $0x1e9] sm:$0xff] }
 0x246   : > { %v1853_v62 = vadd.f32 %v1821_v34, %v1720_v53  ;;  %v1213_v63 = vadd.f32 %v1181_v15, %v1066_v3  ;;  %2774 = vmatmul.mubr.msk.bf16.gmra.mrb[20].mxu1 %vm514_vm0, %v2076_v7  ;;  %v1419_v24 = vmul.f32 %v4218_v25, %v4389_v18  ;;  %v1420_v43 = vmul.f32 %v4218_v25, %v4391_v2 }
 0x247   : > { %v1854_v1 = vadd.f32 %v1822_v6, %v1721_v38  ;;  %v1214_v12 = vadd.f32 %v1182_v10, %v1067_v33  ;;  %v1556_v46 = vmul.f32 %v4226_v42, %v1885_v19  ;;  %v4441_v52 = vsel %vm792_vm1, %v1621_v14, 0.0 }
 0x248   : > { %v1986_v5 = vadd.f32 %v1954_v28, %v1853_v62  ;;  %v1350_v17 = vadd.f32 %v1318_v35, %v1213_v63  ;;  %v1557_v45 = vmul.f32 %v4226_v42, %v1918_v22  ;;  %v1691_v60 = vmul.f32 %v4242_v16, %v4429_v50  ;;  %v1624_v63 = vld [vmem:[#allocation2 + $0x20f] sm:$0xff] }
 0x249   : > { %v1987_v57 = vadd.f32 %v1955_v4, %v1854_v1  ;;  %v1351_v26 = vadd.f32 %v1319_v11, %v1214_v12  ;;  %v1690_v48 = vmul.f32 %v4242_v16, %v4441_v52  ;;  %v1823_v59 = vmul.f32 %v4173_v51, %v4436_v20  ;;  %v1623_v4 = vld [vmem:[#allocation2 + $0x207] sm:$0xff] }
 0x24a   : > { %v2025_v44 = vadd.f32 %v4307_v47, %v1986_v5  ;;  %v1451_v36 = vadd.f32 %v1419_v24, %v1350_v17  ;;  %v1824_v55 = vmul.f32 %v4173_v51, %v4443_v40  ;;  %v1920_v0 = vsel %vm1073_vm2, %v1888_v58, 0.0  ;;  %v1756_v24 = vld [vmem:[#allocation2 + $0x208] sm:$0xff]  ;;  %v1890_v58 = vld [vmem:[#allocation2 + $0x211] sm:$0xff] }
 0x24b   : > { %v2026_v34 = vadd.f32 %v4307_v47, %v1987_v57  ;;  %v1452_v6 = vadd.f32 %v1420_v43, %v1351_v26  ;;  %v903_v29 = vmul.f32 %v4187_v54, %v4398_v56  ;;  %v904_v23 = vmul.f32 %v4187_v54, %v4385_v61 }
 0x24c   : > { %v2057_v13 = vmax.f32 %v2025_v44, 0.0  ;;  %v1588_v30 = vadd.f32 %v1556_v46, %v1451_v36  ;;  %v1036_v27 = vmul.f32 %v4197_v31, %v4389_v18  ;;  %v1037_v15 = vmul.f32 %v4197_v31, %v4391_v2 }
 0x24d   : > { %v2058_v49 = vmax.f32 %v2026_v34, 0.0  ;;  %v1589_v39 = vadd.f32 %v1557_v45, %v1452_v6  ;;  %v1183_v28 = vmul.f32 %v4203_v8, %v1885_v19  ;;  %v1184_v3 = vmul.f32 %v4203_v8, %v1918_v22 }
 0x24e   : > { %v1722_v53 = vadd.f32 %v1690_v48, %v1588_v30  ;;  %v1320_v56 = vmul.f32 %v4211_v9, %v4441_v52  ;;  %v1068_v61 = vadd.f32 %v1036_v27, %v903_v29  ;;  %v1069_v38 = vadd.f32 %v1037_v15, %v904_v23  ;;  %v1757_v48 = vld [vmem:[#allocation2 + $0x210] sm:$0xff] }
 0x24f   : > { %v2077_v10 = vpack.c.bf16 %v2058_v49, %v2057_v13  ;;  %v1723_v7 = vadd.f32 %v1691_v60, %v1589_v39  ;;  %v1956_v14 = vmul.f32 %v4193_v21, %v1887_v37  ;;  %v1321_v18 = vmul.f32 %v4211_v9, %v4429_v50  ;;  %v1889_v49 = vld [vmem:[#allocation2 + $0x209] sm:$0xff] }
 0x250   : > { %v1855_v33 = vadd.f32 %v1823_v59, %v1722_v53  ;;  %v1957_v19 = vmul.f32 %v4193_v21, %v1920_v0  ;;  %v1215_v22 = vadd.f32 %v1183_v28, %v1068_v61  ;;  %v1216_v62 = vadd.f32 %v1184_v3, %v1069_v38 }
 0x251   : > { %2777 = vmatprep.mubr.msk.bf16.mxu1 %vm514_vm0, %v2077_v10  ;;  %v1856_v2 = vadd.f32 %v1824_v55, %v1723_v7  ;;  %v1421_v11 = vmul.f32 %v4218_v25, %v4436_v20  ;;  %v1422_v1 = vmul.f32 %v4218_v25, %v4443_v40  ;;  %v1655_v12 = vsel %vm792_vm1, %v1623_v4, 0.0 }
 0x252   : > { %v1988_v35 = vadd.f32 %v1956_v14, %v1855_v33  ;;  %v1352_v5 = vadd.f32 %v1320_v56, %v1215_v22  ;;  %v1353_v17 = vadd.f32 %v1321_v18, %v1216_v62  ;;  %v1558_v46 = vmul.f32 %v4226_v42, %v1887_v37 }
 0x253   : > { %v1989_v43 = vadd.f32 %v1957_v19, %v1856_v2  ;;  %v1559_v26 = vmul.f32 %v4226_v42, %v1920_v0  ;;  %v1692_v45 = vmul.f32 %v4242_v16, %v1655_v12  ;;  %v1693_v60 = vmul.f32 %v4242_v16, %v1624_v63 }
 0x254   : > { %v2027_v57 = vadd.f32 %v4307_v47, %v1988_v35  ;;  %v1453_v36 = vadd.f32 %v1421_v11, %v1352_v5  ;;  %v1454_v32 = vadd.f32 %v1422_v1, %v1353_v17  ;;  %v1825_v59 = vmul.f32 %v4173_v51, %v1756_v24 }
 0x255   : > { %v2028_v44 = vadd.f32 %v4307_v47, %v1989_v43  ;;  %v1922_v6 = vsel %vm1073_vm2, %v1890_v58, 0.0  ;;  %v905_v55 = vmul.f32 %v4187_v54, %v4441_v52  ;;  %v906_v13 = vmul.f32 %v4187_v54, %v4429_v50 }
 0x256   : > { %v2059_v34 = vmax.f32 %v2027_v57, 0.0  ;;  %v1590_v29 = vadd.f32 %v1558_v46, %v1453_v36  ;;  %v1591_v23 = vadd.f32 %v1559_v26, %v1454_v32  ;;  %v1038_v39 = vmul.f32 %v4197_v31, %v4436_v20  ;;  %v2945_v32 = vld [vmem:[%s3556_s13] sm:$0xff]  }
 0x257   : > { %v2060_v30 = vmax.f32 %v2028_v44, 0.0  ;;  %v1826_v27 = vmul.f32 %v4173_v51, %v1757_v48  ;;  %v1039_v15 = vmul.f32 %v4197_v31, %v4443_v40  ;;  %v1185_v41 = vmul.f32 %v4203_v8, %v1887_v37  ;;  %v4519_v44 = vld [vmem:[#allocation14] ss:$0 sm:$0xff] }
 0x258   : > { %v1186_v53 = vmul.f32 %v4203_v8, %v1920_v0  ;;  %v1724_v28 = vadd.f32 %v1692_v45, %v1590_v29  ;;  %v1725_v3 = vadd.f32 %v1693_v60, %v1591_v23  ;;  %v1070_v54 = vadd.f32 %v1038_v39, %v905_v55 }
 0x259   : > { %v2078_v52 = vpack.c.bf16 %v2060_v30, %v2059_v34  ;;  %v1958_v50 = vmul.f32 %v4193_v21, %v1889_v49  ;;  %v1959_v56 = vmul.f32 %v4193_v21, %v1922_v6  ;;  %v1071_v10 = vadd.f32 %v1039_v15, %v906_v13 }
 0x25a   : > { %v1857_v20 = vadd.f32 %v1825_v59, %v1724_v28  ;;  %v1858_v7 = vadd.f32 %v1826_v27, %v1725_v3  ;;  %v1217_v61 = vadd.f32 %v1185_v41, %v1070_v54  ;;  %v1322_v31 = vmul.f32 %v4211_v9, %v1655_v12  ;;  %v2946_v54 = vld [vmem:[%s3556_s13 + $0x18] sm:$0xff]  }
 0x25b   : > { %2778 = vmatmul.mubr.msk.bf16.gmra.mrb[24].mxu1 %vm514_vm0, %v2078_v52  ;;  %v1218_v40 = vadd.f32 %v1186_v53, %v1071_v10  ;;  %v1323_v37 = vmul.f32 %v4211_v9, %v1624_v63  ;;  %v1423_v4 = vmul.f32 %v4218_v25, %v1756_v24  ;;  %v1424_v14 = vmul.f32 %v4218_v25, %v1757_v48  ;;  %v2947_v10 = vld [vmem:[%s3556_s13 + $0x10] sm:$0xff]  }
 0x25c   : > { %v1990_v8 = vadd.f32 %v1958_v50, %v1857_v20  ;;  %v1991_v0 = vadd.f32 %v1959_v56, %v1858_v7  ;;  %v1354_v38 = vadd.f32 %v1322_v31, %v1217_v61  ;;  %v1560_v18 = vmul.f32 %v4226_v42, %v1889_v49 }
 0x25d   : > { %v1355_v33 = vadd.f32 %v1323_v37, %v1218_v40  ;;  %v1694_v62 = vmul.f32 0.0, %v4242_v16  ;;  %v1561_v9 = vmul.f32 %v4226_v42, %v1922_v6  ;;  %v1827_v12 = vmul.f32 0.0, %v4173_v51 }
 0x25e   : > { %v2029_v2 = vadd.f32 %v4307_v47, %v1990_v8  ;;  %v2030_v19 = vadd.f32 %v4307_v47, %v1991_v0  ;;  %v1455_v22 = vadd.f32 %v1423_v4, %v1354_v38  ;;  %v1960_v5 = vmul.f32 0.0, %v4193_v21  ;;  %v2944_v21 = vld [vmem:[%s3556_s13 + $0x8] sm:$0xff]  }
 0x25f   : > { %v1456_v35 = vadd.f32 %v1424_v14, %v1355_v33  ;;  %v2315_v36 = vunpack.c.l.bf16 %v2944_v21  ;;  %v2313_v48 = vunpack.c.l.bf16 %v2945_v32  ;;  %v2316_v55 = vunpack.c.h.bf16 %v2944_v21 }
 0x260   : > { %v2061_v63 = vmax.f32 %v2029_v2, 0.0  ;;  %v2062_v11 = vmax.f32 %v2030_v19, 0.0  ;;  %v1592_v1 = vadd.f32 %v1560_v18, %v1455_v22  ;;  %v2314_v13 = vunpack.c.h.bf16 %v2945_v32 }
 0x261   : > { %v1593_v24 = vadd.f32 %v1561_v9, %v1456_v35  ;;  %v2319_v50 = vunpack.c.l.bf16 %v2946_v54  ;;  %v2317_v20 = vunpack.c.l.bf16 %v2947_v10  ;;  %v2320_v31 = vunpack.c.h.bf16 %v2946_v54  ;;  %v2948_v9 = vld [vmem:[%s3556_s13 + $0x28] sm:$0xff]  }
 0x262   : > { %v2079_v43 = vpack.c.bf16 %v2062_v11, %v2061_v63  ;;  %v1726_v25 = vadd.f32 %v1694_v62, %v1592_v1  ;;  %v2318_v8 = vunpack.c.h.bf16 %v2947_v10  ;;  %v2323_v63 = vunpack.c.l.bf16 %v2948_v9  ;;  %v2949_v1 = vld [vmem:[%s3556_s13 + $0x20] sm:$0xff]   ;;  %v2952_v10 = vld [vmem:[%s3556_s13 + $0x48] sm:$0xff]  }
 0x263   : > { %v1727_v17 = vadd.f32 %v1694_v62, %v1593_v24 }
 0x264   : > { %2781 = vmatprep.mubr.msk.bf16.mxu1 %vm514_vm0, %v2079_v43  ;;  %v1859_v46 = vadd.f32 %v1827_v12, %v1726_v25  ;;  %v2324_v25 = vunpack.c.h.bf16 %v2948_v9 }
 0x265   : > { %v1860_v16 = vadd.f32 %v1827_v12, %v1727_v17  ;;  %v2321_v12 = vunpack.c.l.bf16 %v2949_v1 }
 0x266   : > { %v1992_v58 = vadd.f32 %v1960_v5, %v1859_v46  ;;  %v2322_v46 = vunpack.c.h.bf16 %v2949_v1  ;;  %v2954_v1 = vld [vmem:[%s3556_s13 + $0x58] sm:$0xff]  }
 0x267   : > { %v1993_v42 = vadd.f32 %v1960_v5, %v1860_v16 }
 0x268   : > { %v2031_v57 = vadd.f32 %v4307_v47, %v1992_v58 }
 0x269   : > { %v2032_v26 = vadd.f32 %v4307_v47, %v1993_v42 }
 0x26a   : > { %v2063_v51 = vmax.f32 %v2031_v57, 0.0 }
 0x26b   : > { %v2064_v45 = vmax.f32 %v2032_v26, 0.0 }
 0x26d   : > { %v2080_v60 = vpack.c.bf16 %v2064_v45, %v2063_v51 }
 0x26f   : > { %2782 = vmatmul.mubr.msk.bf16.gmra.mrb[28].mxu1 %vm514_vm0, %v2080_v60 }
 0x2a9   : > { %v2755_v59 = vpop.f32.mrb[0].mxu1 }
 0x2aa   : > { %v2195_v34 = vadd.f32 %v2755_v59, %v4519_v44  ;;  %v2186_v6 = vpop.f32.mrb[1].mxu1 }
 0x2ab   : > { %v2187_v47 = vadd.f32 %v4519_v44, %v2186_v6  ;;  %v2756_v30 = vpop.f32.mrb[2].mxu1  ;;  %v2951_v6 = vld [vmem:[%s3556_s13 + $0x30] sm:$0xff]  }
 0x2ac   : > { %v2347_v29 = vadd.f32 %v2315_v36, %v2195_v34  ;;  %v2198_v23 = vadd.f32 %v2756_v30, %v4519_v44  ;;  %v2189_v49 = vpop.f32.mrb[3].mxu1 }
 0x2ad   : > { %v2345_v39 = vadd.f32 %v2313_v48, %v2187_v47  ;;  %v2190_v27 = vadd.f32 %v4519_v44, %v2189_v49  ;;  %v2950_v48 = vld [vmem:[%s3556_s13 + $0x38] sm:$0xff]   ;;  %v2326_v49 = vunpack.c.h.bf16 %v2951_v6 }
 0x2ae   : > { %v2379_v15 = vmax.f32 %v2347_v29, 0.0  ;;  %v2348_v41 = vadd.f32 %v2316_v55, %v2198_v23  ;;  %v2327_v59 = vunpack.c.l.bf16 %v2950_v48  ;;  %v2325_v55 = vunpack.c.l.bf16 %v2951_v6  ;;  %v2956_v6 = vld [vmem:[%s3556_s13 + $0x68] sm:$0xff]  }
 0x2af   : > { %v2377_v53 = vmax.f32 %v2345_v39, 0.0  ;;  %v2346_v52 = vadd.f32 %v2314_v13, %v2190_v27  ;;  %v2328_v30 = vunpack.c.h.bf16 %v2950_v48 }
 0x2b0   : > { %2411 = vst.msk [vmem:[%s4528_s23 + $0x10] sm:$0xff] %vm514_vm0, %v2379_v15  ;;  %v2380_v28 = vmax.f32 %v2348_v41, 0.0 }
 0x2b1   : > { %2409 = vst.msk [vmem:[%s4528_s23] sm:$0xff] %vm514_vm0, %v2377_v53  ;;  %v2378_v3 = vmax.f32 %v2346_v52, 0.0 }
 0x2b2   : > { %2412 = vst.msk [vmem:[%s4528_s23 + $0x18] sm:$0xff] %vm514_vm0, %v2380_v28 }
 0x2b3   : > { %2410 = vst.msk [vmem:[%s4528_s23 + $0x8] sm:$0xff] %vm514_vm0, %v2378_v3 }
 0x2c4   : > { %v2759_v56 = vpop.f32.mrb[4].mxu1 }
 0x2c5   : > { %v2211_v7 = vadd.f32 %v2759_v56, %v4519_v44  ;;  %v2202_v61 = vpop.f32.mrb[5].mxu1 }
 0x2c6   : > { %v2203_v40 = vadd.f32 %v4519_v44, %v2202_v61  ;;  %v2760_v37 = vpop.f32.mrb[6].mxu1  ;;  %v2953_v61 = vld [vmem:[%s3556_s13 + $0x40] sm:$0xff]  }
 0x2c7   : > { %v2351_v0 = vadd.f32 %v2319_v50, %v2211_v7  ;;  %v2214_v38 = vadd.f32 %v2760_v37, %v4519_v44  ;;  %v2205_v4 = vpop.f32.mrb[7].mxu1 }
 0x2c8   : > { %v2349_v33 = vadd.f32 %v2317_v20, %v2203_v40  ;;  %v2206_v14 = vadd.f32 %v4519_v44, %v2205_v4  ;;  %v2331_v20 = vunpack.c.l.bf16 %v2952_v10  ;;  %v2330_v4 = vunpack.c.h.bf16 %v2953_v61 }
 0x2c9   : > { %v2383_v18 = vmax.f32 %v2351_v0, 0.0  ;;  %v2352_v2 = vadd.f32 %v2320_v31, %v2214_v38  ;;  %v2329_v31 = vunpack.c.l.bf16 %v2953_v61  ;;  %v2958_v61 = vld [vmem:[%s3556_s13 + $0x78] sm:$0xff]  }
 0x2ca   : > { %v2381_v19 = vmax.f32 %v2349_v33, 0.0  ;;  %v2350_v22 = vadd.f32 %v2318_v8, %v2206_v14  ;;  %v2332_v8 = vunpack.c.h.bf16 %v2952_v10 }
 0x2cb   : > { %2415 = vst.msk [vmem:[%s4528_s23 + $0x30] sm:$0xff] %vm514_vm0, %v2383_v18  ;;  %v2384_v62 = vmax.f32 %v2352_v2, 0.0 }
 0x2cc   : > { %2413 = vst.msk [vmem:[%s4528_s23 + $0x20] sm:$0xff] %vm514_vm0, %v2381_v19  ;;  %v2382_v35 = vmax.f32 %v2350_v22, 0.0 }
 0x2cd   : > { %2416 = vst.msk [vmem:[%s4528_s23 + $0x38] sm:$0xff] %vm514_vm0, %v2384_v62 }
 0x2ce   : > { %2414 = vst.msk [vmem:[%s4528_s23 + $0x28] sm:$0xff] %vm514_vm0, %v2382_v35 }
 0x2da   : > { %v2763_v11 = vpop.f32.mrb[8].mxu1 }
 0x2db   : > { %v2227_v24 = vadd.f32 %v2763_v11, %v4519_v44  ;;  %v2218_v43 = vpop.f32.mrb[9].mxu1 }
 0x2dc   : > { %v2219_v5 = vadd.f32 %v4519_v44, %v2218_v43  ;;  %v2764_v17 = vpop.f32.mrb[10].mxu1  ;;  %v2955_v43 = vld [vmem:[%s3556_s13 + $0x50] sm:$0xff]  }
 0x2dd   : > { %v2355_v16 = vadd.f32 %v2323_v63, %v2227_v24  ;;  %v2230_v58 = vadd.f32 %v2764_v17, %v4519_v44  ;;  %v2221_v42 = vpop.f32.mrb[11].mxu1 }
 0x2de   : > { %v2353_v57 = vadd.f32 %v2321_v12, %v2219_v5  ;;  %v2222_v26 = vadd.f32 %v4519_v44, %v2221_v42  ;;  %v2335_v12 = vunpack.c.l.bf16 %v2954_v1  ;;  %v2334_v42 = vunpack.c.h.bf16 %v2955_v43 }
 0x2df   : > { %v2387_v51 = vmax.f32 %v2355_v16, 0.0  ;;  %v2356_v45 = vadd.f32 %v2324_v25, %v2230_v58  ;;  %v2333_v25 = vunpack.c.l.bf16 %v2955_v43 }
 0x2e0   : > { %v2385_v60 = vmax.f32 %v2353_v57, 0.0  ;;  %v2354_v21 = vadd.f32 %v2322_v46, %v2222_v26  ;;  %v2336_v46 = vunpack.c.h.bf16 %v2954_v1 }
 0x2e1   : > { %2419 = vst.msk [vmem:[%s4528_s23 + $0x50] sm:$0xff] %vm514_vm0, %v2387_v51  ;;  %v2388_v36 = vmax.f32 %v2356_v45, 0.0 }
 0x2e2   : > { %2417 = vst.msk [vmem:[%s4528_s23 + $0x40] sm:$0xff] %vm514_vm0, %v2385_v60  ;;  %v2386_v32 = vmax.f32 %v2354_v21, 0.0 }
 0x2e3   : > { %2420 = vst.msk [vmem:[%s4528_s23 + $0x58] sm:$0xff] %vm514_vm0, %v2388_v36 }
 0x2e4   : > { %2418 = vst.msk [vmem:[%s4528_s23 + $0x48] sm:$0xff] %vm514_vm0, %v2386_v32 }
 0x2f0   : > { %v2767_v34 = vpop.f32.mrb[12].mxu1 }
 0x2f1   : > { %v2243_v13 = vadd.f32 %v2767_v34, %v4519_v44  ;;  %v2234_v47 = vpop.f32.mrb[13].mxu1 }
 0x2f2   : > { %v2235_v29 = vadd.f32 %v4519_v44, %v2234_v47  ;;  %v2768_v23 = vpop.f32.mrb[14].mxu1  ;;  %v2957_v47 = vld [vmem:[%s3556_s13 + $0x60] sm:$0xff]  }
 0x2f3   : > { %v2359_v39 = vadd.f32 %v2327_v59, %v2243_v13  ;;  %v2246_v27 = vadd.f32 %v2768_v23, %v4519_v44  ;;  %v2237_v15 = vpop.f32.mrb[15].mxu1 }
 0x2f4   : > { %v2357_v41 = vadd.f32 %v2325_v55, %v2235_v29  ;;  %v2238_v53 = vadd.f32 %v4519_v44, %v2237_v15  ;;  %v2339_v55 = vunpack.c.l.bf16 %v2956_v6  ;;  %v2338_v15 = vunpack.c.h.bf16 %v2957_v47 }
 0x2f5   : > { %v2391_v52 = vmax.f32 %v2359_v39, 0.0  ;;  %v2360_v28 = vadd.f32 %v2328_v30, %v2246_v27  ;;  %v2337_v30 = vunpack.c.l.bf16 %v2957_v47 }
 0x2f6   : > { %v2389_v3 = vmax.f32 %v2357_v41, 0.0  ;;  %v2358_v54 = vadd.f32 %v2326_v49, %v2238_v53  ;;  %v2340_v49 = vunpack.c.h.bf16 %v2956_v6 }
 0x2f7   : > { %2423 = vst.msk [vmem:[%s4528_s23 + $0x70] sm:$0xff] %vm514_vm0, %v2391_v52  ;;  %v2392_v50 = vmax.f32 %v2360_v28, 0.0 }
 0x2f8   : > { %2421 = vst.msk [vmem:[%s4528_s23 + $0x60] sm:$0xff] %vm514_vm0, %v2389_v3  ;;  %v2390_v56 = vmax.f32 %v2358_v54, 0.0 }
 0x2f9   : > { %2424 = vst.msk [vmem:[%s4528_s23 + $0x78] sm:$0xff] %vm514_vm0, %v2392_v50 }
 0x2fa   : > { %2422 = vst.msk [vmem:[%s4528_s23 + $0x68] sm:$0xff] %vm514_vm0, %v2390_v56 }
 0x305   : > { %v2771_v7 = vpop.f32.mrb[16].mxu1 }
 0x306   : > { %v2259_v40 = vadd.f32 %v2771_v7, %v4519_v44  ;;  %v2250_v37 = vpop.f32.mrb[17].mxu1 }
 0x307   : > { %v2251_v0 = vadd.f32 %v4519_v44, %v2250_v37  ;;  %v2772_v38 = vpop.f32.mrb[18].mxu1  ;;  %v2959_v37 = vld [vmem:[%s3556_s13 + $0x70] sm:$0xff]  }
 0x308   : > { %v2363_v33 = vadd.f32 %v2331_v20, %v2259_v40  ;;  %v2262_v14 = vadd.f32 %v2772_v38, %v4519_v44  ;;  %v2253_v18 = vpop.f32.mrb[19].mxu1 }
 0x309   : > { %v2361_v2 = vadd.f32 %v2329_v31, %v2251_v0  ;;  %v2254_v19 = vadd.f32 %v4519_v44, %v2253_v18  ;;  %v2343_v31 = vunpack.c.l.bf16 %v2958_v61  ;;  %v2342_v18 = vunpack.c.h.bf16 %v2959_v37 }
 0x30a   : > { %v2395_v22 = vmax.f32 %v2363_v33, 0.0  ;;  %v2364_v62 = vadd.f32 %v2332_v8, %v2262_v14  ;;  %v2341_v8 = vunpack.c.l.bf16 %v2959_v37 }
 0x30b   : > { %v2393_v35 = vmax.f32 %v2361_v2, 0.0  ;;  %v2362_v9 = vadd.f32 %v2330_v4, %v2254_v19  ;;  %v2344_v4 = vunpack.c.h.bf16 %v2958_v61 }
 0x30c   : > { %2427 = vst.msk [vmem:[%s4528_s23 + $0x90] sm:$0xff] %vm514_vm0, %v2395_v22  ;;  %v2396_v63 = vmax.f32 %v2364_v62, 0.0 }
 0x30d   : > { %2425 = vst.msk [vmem:[%s4528_s23 + $0x80] sm:$0xff] %vm514_vm0, %v2393_v35  ;;  %v2394_v11 = vmax.f32 %v2362_v9, 0.0 }
 0x30e   : > { %2428 = vst.msk [vmem:[%s4528_s23 + $0x98] sm:$0xff] %vm514_vm0, %v2396_v63 }
 0x30f   : > { %2426 = vst.msk [vmem:[%s4528_s23 + $0x88] sm:$0xff] %vm514_vm0, %v2394_v11 }
 0x319   : > { %v2775_v24 = vpop.f32.mrb[20].mxu1 }
 0x31a   : > { %v2275_v5 = vadd.f32 %v2775_v24, %v4519_v44  ;;  %v2266_v17 = vpop.f32.mrb[21].mxu1 }
 0x31b   : > { %v2267_v16 = vadd.f32 %v4519_v44, %v2266_v17  ;;  %v2776_v58 = vpop.f32.mrb[22].mxu1 }
 0x31c   : > { %v2367_v57 = vadd.f32 %v2335_v12, %v2275_v5  ;;  %v2278_v26 = vadd.f32 %v2776_v58, %v4519_v44  ;;  %v2269_v51 = vpop.f32.mrb[23].mxu1 }
 0x31d   : > { %v2365_v45 = vadd.f32 %v2333_v25, %v2267_v16  ;;  %v2270_v60 = vadd.f32 %v4519_v44, %v2269_v51 }
 0x31e   : > { %v2399_v21 = vmax.f32 %v2367_v57, 0.0  ;;  %v2368_v36 = vadd.f32 %v2336_v46, %v2278_v26 }
 0x31f   : > { %v2397_v32 = vmax.f32 %v2365_v45, 0.0  ;;  %v2366_v48 = vadd.f32 %v2334_v42, %v2270_v60 }
 0x320   : > { %2431 = vst.msk [vmem:[%s4528_s23 + $0xb0] sm:$0xff] %vm514_vm0, %v2399_v21  ;;  %v2400_v59 = vmax.f32 %v2368_v36, 0.0 }
 0x321   : > { %2429 = vst.msk [vmem:[%s4528_s23 + $0xa0] sm:$0xff] %vm514_vm0, %v2397_v32  ;;  %v2398_v34 = vmax.f32 %v2366_v48, 0.0 }
 0x322   : > { %2432 = vst.msk [vmem:[%s4528_s23 + $0xb8] sm:$0xff] %vm514_vm0, %v2400_v59 }
 0x323   : > { %2430 = vst.msk [vmem:[%s4528_s23 + $0xa8] sm:$0xff] %vm514_vm0, %v2398_v34 }
 0x32e   : > { %v2779_v13 = vpop.f32.mrb[24].mxu1 }
 0x32f   : > { %v2291_v29 = vadd.f32 %v2779_v13, %v4519_v44  ;;  %v2282_v23 = vpop.f32.mrb[25].mxu1 }
 0x330   : > { %v2283_v39 = vadd.f32 %v4519_v44, %v2282_v23  ;;  %v2780_v27 = vpop.f32.mrb[26].mxu1 }
 0x331   : > { %v2371_v41 = vadd.f32 %v2339_v55, %v2291_v29  ;;  %v2294_v53 = vadd.f32 %v2780_v27, %v4519_v44  ;;  %v2285_v52 = vpop.f32.mrb[27].mxu1 }
 0x332   : > { %v2369_v28 = vadd.f32 %v2337_v30, %v2283_v39  ;;  %v2286_v3 = vadd.f32 %v4519_v44, %v2285_v52 }
 0x333   : > { %v2403_v54 = vmax.f32 %v2371_v41, 0.0  ;;  %v2372_v50 = vadd.f32 %v2340_v49, %v2294_v53 }
 0x334   : > { %v2401_v56 = vmax.f32 %v2369_v28, 0.0  ;;  %v2370_v10 = vadd.f32 %v2338_v15, %v2286_v3 }
 0x335   : > { %2435 = vst.msk [vmem:[%s4528_s23 + $0xd0] sm:$0xff] %vm514_vm0, %v2403_v54  ;;  %v2404_v20 = vmax.f32 %v2372_v50, 0.0 }
 0x336   : > { %2433 = vst.msk [vmem:[%s4528_s23 + $0xc0] sm:$0xff] %vm514_vm0, %v2401_v56  ;;  %v2402_v7 = vmax.f32 %v2370_v10, 0.0 }
 0x337   : > { %2436 = vst.msk [vmem:[%s4528_s23 + $0xd8] sm:$0xff] %vm514_vm0, %v2404_v20 }
 0x338   : > { %2434 = vst.msk [vmem:[%s4528_s23 + $0xc8] sm:$0xff] %vm514_vm0, %v2402_v7 }
 0x342   : > { %v2783_v40 = vpop.f32.mrb[28].mxu1 }
 0x343   : > { %v2307_v0 = vadd.f32 %v2783_v40, %v4519_v44  ;;  %v2298_v38 = vpop.f32.mrb[29].mxu1 }
 0x344   : > { %v2299_v33 = vadd.f32 %v4519_v44, %v2298_v38  ;;  %v2784_v14 = vpop.f32.mrb[30].mxu1 }
 0x345   : > { %v2375_v2 = vadd.f32 %v2343_v31, %v2307_v0  ;;  %v2310_v19 = vadd.f32 %v2784_v14, %v4519_v44  ;;  %v2301_v22 = vpop.f32.mrb[31].mxu1 }
 0x346   : > { %v2373_v62 = vadd.f32 %v2341_v8, %v2299_v33  ;;  %v2302_v35 = vadd.f32 %v4519_v44, %v2301_v22 }
 0x347   : > { %v2407_v9 = vmax.f32 %v2375_v2, 0.0  ;;  %v2376_v63 = vadd.f32 %v2344_v4, %v2310_v19 }
 0x348   : > { %v2405_v11 = vmax.f32 %v2373_v62, 0.0  ;;  %v2374_v1 = vadd.f32 %v2342_v18, %v2302_v35 }
 0x349   : > { %2439 = vst.msk [vmem:[%s4528_s23 + $0xf0] sm:$0xff] %vm514_vm0, %v2407_v9  ;;  %v2408_v12 = vmax.f32 %v2376_v63, 0.0 }
 0x34a   : > { %2437 = vst.msk [vmem:[%s4528_s23 + $0xe0] sm:$0xff] %vm514_vm0, %v2405_v11  ;;  %v2406_v44 = vmax.f32 %v2374_v1, 0.0 }
 0x34b   : > { %2440 = vst.msk [vmem:[%s4528_s23 + $0xf8] sm:$0xff] %vm514_vm0, %v2408_v12 }
 0x34c   : > { %2438 = vst.msk [vmem:[%s4528_s23 + $0xe8] sm:$0xff] %vm514_vm0, %v2406_v44 }
 0x34d   : > { %3171 = shalt.err (!%p3168_p8)
}
 0x34e   : > { %s3172_s29 = scalar_lea.hbm %s4635_s18, 4096  ;;  %s3176_s23 = scalar_lea.hbm %s4694_s7, 8192 }
 0x34f   : > { %p3173_p7 = scmp.ne.s32.totalorder %s4635_s18, %s3172_s29  ;;  %p3177_p3 = scmp.lt.u32.totalorder %s4635_s18, %s4694_s7 }
 0x350   : > { %p3178_p0 = scmp.lt.u32.totalorder %s3176_s23, %s3172_s29  ;;  %p3180_p6 = scmp.lt.u32.totalorder %s3172_s29, %s4635_s18 }
 0x351   : > { %p3174_p9 = pnand %p3173_p7, %p4716_p5 }
 0x352   : > { %p3179_p2 = por %p3178_p0, %p3177_p3 }
 0x353   : > { %p3175_p4 = pneg %p3174_p9 }
 0x354   : > { %p3181_p10 = por %p3180_p6, %p3179_p2 }
 0x356   : > { %p3182_p1 = pnand %p3181_p10, %p3175_p4 }
 0x358   : > { %3185 = shalt.err (!%p3182_p1)
}
 0x359   : > { %s3250_s15 = smov 128   ;;  %s3251_s16 = smov 8  }
 0x35a   : > { %2811 = dma.vmem_to_hbm [thread:$0]  (%p4716_p5), %s4637_s17, 4096, %s4635_s18, %s2442_s30, %s3250_s15, %s3250_s15, %s3251_s16  }
 0x35b PF: > { %s2470_s22 = sand.u32 1, %s3224_s24   ;;  %p4717_p11 = scmp.ne.s32.totalorder %s4706_s10, 0 }
 0x35c   : > { %p4718_p12 = scmp.ge.s32.totalorder %s3236_s27, 2  ;;  %s2471_s14 = scalar_lea.sflag [#allocation5], %s2470_s22 }
 0x35e   : > { %p2837_p13 = pnand %p4718_p12, %p4717_p11 }
 0x360   : > { %3219 = dma.done.wait (!%p2837_p13), %s2471_s14, 4096  }
 0x361   : > { %3221 = vsyncadd (!%p2837_p13), %s2471_s14, 4294963200  ;;  %p23_p8 = scmp.ge.s32.totalorder %s3470_s11, 4   ;;  %s4719_s24 = smov %s3228_s25 }
 0x362   : > { %s4720_s25 = smov %s3232_s26  ;;  %s4721_s26 = smov %s3481_s20 }
 0x363   : > { %s4722_s27 = smov %s3470_s11  ;;  %25 = sbr.rel (!%p23_p8) target bundleno = 8 (0x8), region = 119 }
 0x36a   :  { %2476 = vsyncpa [#allocation4], 1 }
 0x36b   :  { %2478 = vsyncpa [#allocation4 + $0x1], 1 }
 0x36c   :  { %2479 = vsyncpa [#allocation7], 1 }
 0x36d   :  { %2480 = vsyncpa [#allocation10], 1 }
 0x36e   :  { %2481 = vsyncpa [#allocation13], 1 }
 0x36f   :  { %2482 = vsyncpa [#allocation5], 1 }
 0x370   :  { %2484 = vsyncpa [#allocation5 + $0x1], 1 }

</bundles_post_ra>
